<compile_context>
chip_gen: v5e
topology: v5e:2x2
jax: 0.10.0
libtpu: 0.0.40
codegen_flags: <defaults>
</compile_context>

<pallas_src>
import jax
import jax.numpy as jnp
from jax.experimental import pallas as pl
from jax.experimental.pallas import tpu as pltpu

DOWN_DIM = 256
BN_EPS = 1e-3
_MAX_PIXELS_PER_STEP = 2048        # lane budget per grid step (amortizes ~0.35 us/step)
_IO_BLOCK_BUDGET = 12 << 20        # bytes allowed for the 3 double-buffered I/O blocks


def _sigmoid_eup(x):
    # exp on the EUP + approx reciprocal on the EUP -> VALU slots stay free for the
    # long elementwise chain (adds, ReLU, BN scale/shift, gating muls, casts).
    return pl.reciprocal(1.0 + jnp.exp(-x), approx=True)


def _make_kernel(nb, c, stacked):
    """Kernel factory. Pixels on lanes, channels on sublanes, nb batch rows/step."""

    def kernel(vq_ref, mem_ref, w1_ref, shift0_ref, *rest):
        if stacked:
            w34_ref, b34_ref, s1_ref, t1_ref, o_ref = rest
        else:
            w3_ref, w4_ref, b3_ref, b4_ref, s1_ref, t1_ref, o_ref = rest

        # Resident parameters: load once per grid step, hoisted out of the nb loop.
        w1 = w1_ref[...]                       # (256, C)  bf16 (bn0 folded in)
        shift0 = shift0_ref[...]               # (256, 1)  f32  (2*b1*s0 + t0)
        s1 = s1_ref[...]                       # (C, 1)    f32  folded output BN
        t1 = t1_ref[...]                       # (C, 1)    f32
        if stacked:
            w34 = w34_ref[...]                 # (2C, 256) bf16 (conv3 | conv4)
            b34 = b34_ref[...]                 # (2C, 1)   f32
        else:
            w3 = w3_ref[...]
            w4 = w4_ref[...]
            b3 = b3_ref[...]
            b4 = b4_ref[...]

        for b in range(nb):                    # static, small unroll
            vq = vq_ref[b].astype(jnp.float32)     # (C, TP)
            mem = mem_ref[b].astype(jnp.float32)   # (C, TP)

            # conv1(vq) + conv1(mem) == conv1(vq + mem)  (linearity); doubled bias
            # and bn0 are folded into w1 / shift0 on the wrapper side.
            s = (vq + mem).astype(jnp.bfloat16)
            fused = jnp.dot(w1, s, preferred_element_type=jnp.float32) + shift0
            fused = jnp.maximum(fused, 0.0).astype(jnp.bfloat16)

            if stacked:
                att = jnp.dot(w34, fused, preferred_element_type=jnp.float32) + b34
                att1 = att[:c, :]
                att2 = att[c:, :]
            else:
                att1 = jnp.dot(w3, fused, preferred_element_type=jnp.float32) + b3
                att2 = jnp.dot(w4, fused, preferred_element_type=jnp.float32) + b4

            out = vq * _sigmoid_eup(att1) + mem * _sigmoid_eup(att2)
            out = out * s1 + t1                # folded output BN (eval mode)
            o_ref[b] = jnp.maximum(out, 0.0).astype(o_ref.dtype)

    return kernel


def _pick_tiles(n, hw, c):
    """Choose (nb, tp): batch rows and pixel lanes per grid step."""
    # Keep the three double-buffered I/O blocks within the VMEM budget.
    max_pixels = max(128, min(_MAX_PIXELS_PER_STEP,
                              (_IO_BLOCK_BUDGET // (3 * 2 * c * 4)) // 128 * 128))
    if hw <= max_pixels:
        tp = hw                                # full pixel axis: always a legal block
    else:
        tp = None
        t = 128
        while t <= max_pixels:                 # largest multiple-of-128 divisor
            if hw % t == 0:
                tp = t
            t += 128
        if tp is None:
            tp = max_pixels                    # cdiv grid; last pixel tile masked
    p_tiles = pl.cdiv(hw, tp)

    nb = 1
    if p_tiles == 1:                           # small HW: fold batch rows per step
        nb = max(1, min(n, max_pixels // max(tp, 1)))

    # Guarantee >= 2 grid steps so both v7x TensorCores get work.
    if pl.cdiv(n, nb) * p_tiles < 2:
        if n >= 2:
            nb = pl.cdiv(n, 2)
        elif hw >= 256 and tp == hw:
            tp = ((pl.cdiv(hw, 2) + 127) // 128) * 128
    return nb, tp


def fusion_down(mem, vq, params, *, nobn=False, out_dtype=None):
    """mem, vq: NCHW arrays of identical shape (N, C, H, W); f32 or bf16."""
    N, C, H, W = mem.shape
    assert vq.shape == mem.shape
    HW = H * W
    out_dtype = mem.dtype if out_dtype is None else out_dtype

    nb, tp = _pick_tiles(N, HW, C)
    grid = (pl.cdiv(N, nb), pl.cdiv(HW, tp))

    # Free reshapes only — no NCHW<->NHWC transposes; pixels land on the lane axis.
    vq3 = vq.reshape(N, C, HW)
    mem3 = mem.reshape(N, C, HW)

    # 1x1 conv weights (out, in, 1, 1) -> (out, in): kernel computes w @ x.
    w1 = params["w1"][:, :, 0, 0]              # (256, C)
    w3 = params["w3"][:, :, 0, 0]              # (C, 256)
    w4 = params["w4"][:, :, 0, 0]              # (C, 256)
    b1 = params["b1"]                          # (256,)

    def fold_bn(gamma, beta, mean, var):
        scale = gamma / jnp.sqrt(var + BN_EPS)
        return scale, beta - mean * scale

    if nobn:
        s0 = jnp.ones((DOWN_DIM,), jnp.float32)
        t0 = jnp.zeros((DOWN_DIM,), jnp.float32)
        s1 = jnp.ones((C,), jnp.float32)
        t1 = jnp.zeros((C,), jnp.float32)
    else:
        s0, t0 = fold_bn(params["bn0_gamma"], params["bn0_beta"],
                         params["bn0_mean"], params["bn0_var"])
        s1, t1 = fold_bn(params["bn_gamma"], params["bn_beta"],
                         params["bn_mean"], params["bn_var"])

    # Fold bn0 + doubled conv1 bias into the first-layer weight (linearity).
    w1p = (w1 * s0[:, None]).astype(jnp.bfloat16)                  # (256, C) bf16
    shift0 = (2.0 * b1 * s0 + t0).reshape(DOWN_DIM, 1).astype(jnp.float32)
    s1c = s1.reshape(C, 1).astype(jnp.float32)
    t1c = t1.reshape(C, 1).astype(jnp.float32)

    stacked = (C % 8 == 0)

    tile = lambda i, p: (i, 0, p)      # data tiles over (batch blocks, pixel tiles)
    full = lambda i, p: (0, 0)         # parameters stay resident in VMEM
    # NOTE: parameter blocks are grid-invariant so Pallas reuses the resident copy
    # instead of re-issuing DMAs; pl.Buffered(1) would also drop their second VMEM
    # buffer (~0.5 MiB of lane padding) but is skipped for lowering portability.

    data_spec = pl.BlockSpec((nb, C, tp), tile)
    in_specs = [
        data_spec,                                  # vq   (nb, C, tp)
        data_spec,                                  # mem  (nb, C, tp)
        pl.BlockSpec((DOWN_DIM, C), full),          # w1'  bf16
        pl.BlockSpec((DOWN_DIM, 1), full),          # shift0
    ]
    args = [vq3, mem3, w1p, shift0]
    if stacked:
        w34 = jnp.concatenate([w3, w4], axis=0).astype(jnp.bfloat16)     # (2C, 256)
        b34 = jnp.concatenate([params["b3"], params["b4"]]).reshape(2 * C, 1)
        in_specs += [pl.BlockSpec((2 * C, DOWN_DIM), full),
                     pl.BlockSpec((2 * C, 1), full)]
        args += [w34, b34.astype(jnp.float32)]
    else:
        # C not a multiple of 8: slicing a stacked (2C,256) result would cross an
        # 8-sublane boundary and force VMEM re-layout copies -> two matmuls instead.
        in_specs += [pl.BlockSpec((C, DOWN_DIM), full),
                     pl.BlockSpec((C, DOWN_DIM), full),
                     pl.BlockSpec((C, 1), full),
                     pl.BlockSpec((C, 1), full)]
        args += [w3.astype(jnp.bfloat16), w4.astype(jnp.bfloat16),
                 params["b3"].reshape(C, 1).astype(jnp.float32),
                 params["b4"].reshape(C, 1).astype(jnp.float32)]
    in_specs += [pl.BlockSpec((C, 1), full),        # folded BN scale
                 pl.BlockSpec((C, 1), full)]        # folded BN shift
    args += [s1c, t1c]

    in_item = jnp.dtype(mem.dtype).itemsize
    out_item = jnp.dtype(out_dtype).itemsize
    cost = pl.CostEstimate(
        flops=int(2 * N * HW * (DOWN_DIM * C + 2 * C * DOWN_DIM)),
        transcendentals=int(2 * N * C * HW),
        bytes_accessed=int(N * C * HW * (2 * in_item + out_item)
                           + 3 * DOWN_DIM * C * 2),
    )

    out3 = pl.pallas_call(
        _make_kernel(nb, C, stacked),
        out_shape=jax.ShapeDtypeStruct((N, C, HW), out_dtype),
        grid_spec=pltpu.PrefetchScalarGridSpec(
            num_scalar_prefetch=0,
            grid=grid,
            in_specs=in_specs,
            out_specs=pl.BlockSpec((nb, C, tp), tile),
        ),
        compiler_params=pltpu.CompilerParams(
            dimension_semantics=("parallel", "parallel"),
            vmem_limit_bytes=48 * 1024 * 1024,   # above 16/32 MiB defaults, < 64 MiB v7x
        ),
        cost_estimate=cost,
    )(*args)

    return out3.reshape(N, C, H, W)


def _reference(mem, vq, params, *, nobn=False):
    """Pure-JAX f32 reference mirroring the PyTorch forward (eval-mode BN)."""
    def conv(w, b, x):  # 1x1 conv in NCHW
        return jnp.einsum("oc,nchw->nohw", w, x) + b[None, :, None, None]

    def bn(x, gamma, beta, mean, var):
        sc = gamma / jnp.sqrt(var + BN_EPS)
        return (x - mean[None, :, None, None]) * sc[None, :, None, None] \
            + beta[None, :, None, None]

    w1 = params["w1"][:, :, 0, 0]
    w3 = params["w3"][:, :, 0, 0]
    w4 = params["w4"][:, :, 0, 0]

    fused = conv(w1, params["b1"], vq) + conv(w1, params["b1"], mem)
    if not nobn:
        fused = bn(fused, params["bn0_gamma"], params["bn0_beta"],
                   params["bn0_mean"], params["bn0_var"])
    fused = jax.nn.relu(fused)
    att1 = conv(w3, params["b3"], fused)
    att2 = conv(w4, params["b4"], fused)
    out = vq * jax.nn.sigmoid(att1) + mem * jax.nn.sigmoid(att2)
    if not nobn:
        out = bn(out, params["bn_gamma"], params["bn_beta"],
                 params["bn_mean"], params["bn_var"])
    return jax.nn.relu(out)


def make_params(key, stm_val_dim):
    ks = jax.random.split(key, 8)
    p = {
        "w1": 0.05 * jax.random.normal(ks[0], (DOWN_DIM, stm_val_dim, 1, 1), jnp.float32),
        "b1": 0.05 * jax.random.normal(ks[1], (DOWN_DIM,), jnp.float32),
        "w3": 0.05 * jax.random.normal(ks[2], (stm_val_dim, DOWN_DIM, 1, 1), jnp.float32),
        "b3": 0.05 * jax.random.normal(ks[3], (stm_val_dim,), jnp.float32),
        "w4": 0.05 * jax.random.normal(ks[4], (stm_val_dim, DOWN_DIM, 1, 1), jnp.float32),
        "b4": 0.05 * jax.random.normal(ks[5], (stm_val_dim,), jnp.float32),
        # BatchNorm params / running stats (eval mode)
        "bn0_gamma": 1.0 + 0.1 * jax.random.normal(ks[6], (DOWN_DIM,), jnp.float32),
        "bn0_beta": jnp.zeros((DOWN_DIM,), jnp.float32),
        "bn0_mean": jnp.zeros((DOWN_DIM,), jnp.float32),
        "bn0_var": jnp.ones((DOWN_DIM,), jnp.float32),
        "bn_gamma": 1.0 + 0.1 * jax.random.normal(ks[7], (stm_val_dim,), jnp.float32),
        "bn_beta": jnp.zeros((stm_val_dim,), jnp.float32),
        "bn_mean": jnp.zeros((stm_val_dim,), jnp.float32),
        "bn_var": jnp.ones((stm_val_dim,), jnp.float32),
    }
    # conv_layer_2 exists in the module but is unused in forward; omitted here.
    return p


if __name__ == "__main__":
    key = jax.random.PRNGKey(0)
    k_mem, k_vq, k_p = jax.random.split(key, 3)

    N, C, H, W = 2, 64, 16, 16        # stm_val_dim = 64
    mem = jax.random.normal(k_mem, (N, C, H, W), jnp.float32)
    vq = jax.random.normal(k_vq, (N, C, H, W), jnp.float32)
    params = make_params(k_p, C)

    # f32 HBM I/O path (bf16 MXU operands -> slightly looser tolerance vs f32 ref).
    for nobn in (False, True):
        out = jax.block_until_ready(fusion_down(mem, vq, params, nobn=nobn))
        ref = _reference(mem, vq, params, nobn=nobn)
        assert out.shape == (N, C, H, W)
        assert jnp.allclose(out, ref, atol=2e-2, rtol=2e-2), \
            f"mismatch vs JAX reference (nobn={nobn})"

    # bf16 HBM I/O path: only when the surrounding graph already holds bf16
    # (no wrapper-side casts are added inside fusion_down).  Cuts HBM traffic ~2x.
    mem_bf = mem.astype(jnp.bfloat16)
    vq_bf = vq.astype(jnp.bfloat16)
    out_bf = jax.block_until_ready(fusion_down(mem_bf, vq_bf, params, nobn=False))
    ref_bf = _reference(mem_bf.astype(jnp.float32), vq_bf.astype(jnp.float32),
                        params, nobn=False)
    assert out_bf.shape == (N, C, H, W)
    assert out_bf.dtype == jnp.bfloat16
    err = jnp.mean(jnp.abs(out_bf.astype(jnp.float32) - ref_bf))
    assert bool(jnp.isfinite(err)) and float(err) < 2e-2, "bf16 path mismatch"

    print("KERNEL_OK")
</pallas_src>

<mosaic_0001>
module attributes {stable_mosaic.version = 11 : i64} {
  func.func @kernel(%arg0: i32, %arg1: i32, %arg2: memref<1x64x256xf32, #tpu.memory_space<vmem>>, %arg3: memref<1x64x256xf32, #tpu.memory_space<vmem>>, %arg4: memref<256x64xbf16, #tpu.memory_space<vmem>>, %arg5: memref<256x1xf32, #tpu.memory_space<vmem>>, %arg6: memref<128x256xbf16, #tpu.memory_space<vmem>>, %arg7: memref<128x1xf32, #tpu.memory_space<vmem>>, %arg8: memref<64x1xf32, #tpu.memory_space<vmem>>, %arg9: memref<64x1xf32, #tpu.memory_space<vmem>>, %arg10: memref<1x64x256xf32, #tpu.memory_space<vmem>>) attributes {dimension_semantics = [#tpu.dimension_semantics<parallel>, #tpu.dimension_semantics<parallel>], iteration_bounds = array<i64: 2, 1>, scalar_prefetch = 0 : i64, scratch_operands = 0 : i64, tpu.core_type = #tpu.core_type<tc>, window_params = [{transform_indices = @transform_0, window_bounds = array<i64: 1, 64, 256>}, {transform_indices = @transform_1, window_bounds = array<i64: 1, 64, 256>}, {pipeline_mode = #tpu.pipeline_mode<synchronous>, transform_indices = @transform_2, window_bounds = array<i64: 256, 64>}, {pipeline_mode = #tpu.pipeline_mode<synchronous>, transform_indices = @transform_3, window_bounds = array<i64: 256, 1>}, {pipeline_mode = #tpu.pipeline_mode<synchronous>, transform_indices = @transform_4, window_bounds = array<i64: 128, 256>}, {pipeline_mode = #tpu.pipeline_mode<synchronous>, transform_indices = @transform_5, window_bounds = array<i64: 128, 1>}, {pipeline_mode = #tpu.pipeline_mode<synchronous>, transform_indices = @transform_6, window_bounds = array<i64: 64, 1>}, {pipeline_mode = #tpu.pipeline_mode<synchronous>, transform_indices = @transform_7, window_bounds = array<i64: 64, 1>}, {transform_indices = @transform_8, window_bounds = array<i64: 1, 64, 256>}]} {
    %c0 = arith.constant 0 : index
    %c0_0 = arith.constant 0 : index
    %0 = vector.load %arg4[%c0, %c0_0] : memref<256x64xbf16, #tpu.memory_space<vmem>>, vector<256x64xbf16>
    %c0_1 = arith.constant 0 : index
    %c0_2 = arith.constant 0 : index
    %1 = vector.load %arg5[%c0_1, %c0_2] : memref<256x1xf32, #tpu.memory_space<vmem>>, vector<256x1xf32>
    %c0_3 = arith.constant 0 : index
    %c0_4 = arith.constant 0 : index
    %2 = vector.load %arg8[%c0_3, %c0_4] : memref<64x1xf32, #tpu.memory_space<vmem>>, vector<64x1xf32>
    %c0_5 = arith.constant 0 : index
    %c0_6 = arith.constant 0 : index
    %3 = vector.load %arg9[%c0_5, %c0_6] : memref<64x1xf32, #tpu.memory_space<vmem>>, vector<64x1xf32>
    %c0_7 = arith.constant 0 : index
    %c0_8 = arith.constant 0 : index
    %4 = vector.load %arg6[%c0_7, %c0_8] : memref<128x256xbf16, #tpu.memory_space<vmem>>, vector<128x256xbf16>
    %c0_9 = arith.constant 0 : index
    %c0_10 = arith.constant 0 : index
    %5 = vector.load %arg7[%c0_9, %c0_10] : memref<128x1xf32, #tpu.memory_space<vmem>>, vector<128x1xf32>
    %c0_11 = arith.constant 0 : index
    %c0_12 = arith.constant 0 : index
    %c0_13 = arith.constant 0 : index
    %6 = vector.load %arg2[%c0_11, %c0_12, %c0_13] : memref<1x64x256xf32, #tpu.memory_space<vmem>>, vector<1x64x256xf32>
    %7 = vector.shape_cast %6 : vector<1x64x256xf32> to vector<64x256xf32>
    %c0_14 = arith.constant 0 : index
    %c0_15 = arith.constant 0 : index
    %c0_16 = arith.constant 0 : index
    %8 = vector.load %arg3[%c0_14, %c0_15, %c0_16] : memref<1x64x256xf32, #tpu.memory_space<vmem>>, vector<1x64x256xf32>
    %9 = vector.shape_cast %8 : vector<1x64x256xf32> to vector<64x256xf32>
    %10 = arith.addf %7, %9 : vector<64x256xf32>
    %11 = arith.truncf %10 : vector<64x256xf32> to vector<64x256xbf16>
    %cst = arith.constant dense<0.000000e+00> : vector<256x256xf32>
    %12 = tpu.matmul %0, %11, %cst {dimension_numbers = #tpu.dot_dimension_numbers<[1], [0], [0], [1], [0, 0, 1, 1], [], []>} : vector<256x64xbf16>, vector<64x256xbf16>, vector<256x256xf32> -> vector<256x256xf32>
    %13 = vector.broadcast %1 : vector<256x1xf32> to vector<256x256xf32>
    %14 = arith.addf %12, %13 : vector<256x256xf32>
    %cst_17 = arith.constant 0.000000e+00 : f32
    %15 = vector.broadcast %cst_17 : f32 to vector<256x256xf32>
    %16 = arith.maximumf %14, %15 : vector<256x256xf32>
    %17 = arith.truncf %16 : vector<256x256xf32> to vector<256x256xbf16>
    %cst_18 = arith.constant dense<0.000000e+00> : vector<128x256xf32>
    %18 = tpu.matmul %4, %17, %cst_18 {dimension_numbers = #tpu.dot_dimension_numbers<[1], [0], [0], [1], [0, 0, 1, 1], [], []>} : vector<128x256xbf16>, vector<256x256xbf16>, vector<128x256xf32> -> vector<128x256xf32>
    %19 = vector.broadcast %5 : vector<128x1xf32> to vector<128x256xf32>
    %20 = arith.addf %18, %19 : vector<128x256xf32>
    %21 = vector.extract_strided_slice %20 {offsets = [0, 0], sizes = [64, 256], strides = [1, 1]} : vector<128x256xf32> to vector<64x256xf32>
    %22 = vector.extract_strided_slice %20 {offsets = [64, 0], sizes = [64, 256], strides = [1, 1]} : vector<128x256xf32> to vector<64x256xf32>
    %cst_19 = arith.constant 0.000000e+00 : f32
    %23 = vector.broadcast %cst_19 : f32 to vector<64x256xf32>
    %24 = arith.subf %23, %21 : vector<64x256xf32>
    %25 = math.exp %24 : vector<64x256xf32>
    %cst_20 = arith.constant 1.000000e+00 : f32
    %26 = vector.broadcast %cst_20 : f32 to vector<64x256xf32>
    %27 = arith.addf %26, %25 : vector<64x256xf32>
    %28 = tpu.reciprocal %27 {approx = true} : vector<64x256xf32> -> vector<64x256xf32>
    %29 = arith.mulf %7, %28 : vector<64x256xf32>
    %cst_21 = arith.constant 0.000000e+00 : f32
    %30 = vector.broadcast %cst_21 : f32 to vector<64x256xf32>
    %31 = arith.subf %30, %22 : vector<64x256xf32>
    %32 = math.exp %31 : vector<64x256xf32>
    %cst_22 = arith.constant 1.000000e+00 : f32
    %33 = vector.broadcast %cst_22 : f32 to vector<64x256xf32>
    %34 = arith.addf %33, %32 : vector<64x256xf32>
    %35 = tpu.reciprocal %34 {approx = true} : vector<64x256xf32> -> vector<64x256xf32>
    %36 = arith.mulf %9, %35 : vector<64x256xf32>
    %37 = arith.addf %29, %36 : vector<64x256xf32>
    %38 = vector.broadcast %2 : vector<64x1xf32> to vector<64x256xf32>
    %39 = arith.mulf %37, %38 : vector<64x256xf32>
    %40 = vector.broadcast %3 : vector<64x1xf32> to vector<64x256xf32>
    %41 = arith.addf %39, %40 : vector<64x256xf32>
    %cst_23 = arith.constant 0.000000e+00 : f32
    %42 = vector.broadcast %cst_23 : f32 to vector<64x256xf32>
    %43 = arith.maximumf %41, %42 : vector<64x256xf32>
    %c0_24 = arith.constant 0 : index
    %c0_25 = arith.constant 0 : index
    %c0_26 = arith.constant 0 : index
    %44 = vector.load %arg10[%c0_24, %c0_25, %c0_26] : memref<1x64x256xf32, #tpu.memory_space<vmem>>, vector<1x64x256xf32>
    %45 = vector.shape_cast %44 : vector<1x64x256xf32> to vector<64x256xf32>
    %46 = vector.shape_cast %43 : vector<64x256xf32> to vector<1x64x256xf32>
    tpu.vector_store %arg10[%c0_24, %c0_25, %c0_26], %46 {strides = array<i32>} : memref<1x64x256xf32, #tpu.memory_space<vmem>>, vector<1x64x256xf32>,
    return
  }
  func.func @transform_0(%arg0: i32, %arg1: i32) -> (i32, i32, i32) {
    %c0_i32 = arith.constant 0 : i32
    %c0_i32_0 = arith.constant 0 : i32
    return %arg0, %c0_i32, %arg1 : i32, i32, i32
  }
  func.func @transform_1(%arg0: i32, %arg1: i32) -> (i32, i32, i32) {
    %c0_i32 = arith.constant 0 : i32
    %c0_i32_0 = arith.constant 0 : i32
    return %arg0, %c0_i32, %arg1 : i32, i32, i32
  }
  func.func @transform_2(%arg0: i32, %arg1: i32) -> (i32, i32) {
    %c0_i32 = arith.constant 0 : i32
    %c0_i32_0 = arith.constant 0 : i32
    %c0_i32_1 = arith.constant 0 : i32
    return %c0_i32, %c0_i32_0 : i32, i32
  }
  func.func @transform_3(%arg0: i32, %arg1: i32) -> (i32, i32) {
    %c0_i32 = arith.constant 0 : i32
    %c0_i32_0 = arith.constant 0 : i32
    %c0_i32_1 = arith.constant 0 : i32
    return %c0_i32, %c0_i32_0 : i32, i32
  }
  func.func @transform_4(%arg0: i32, %arg1: i32) -> (i32, i32) {
    %c0_i32 = arith.constant 0 : i32
    %c0_i32_0 = arith.constant 0 : i32
    %c0_i32_1 = arith.constant 0 : i32
    return %c0_i32, %c0_i32_0 : i32, i32
  }
  func.func @transform_5(%arg0: i32, %arg1: i32) -> (i32, i32) {
    %c0_i32 = arith.constant 0 : i32
    %c0_i32_0 = arith.constant 0 : i32
    %c0_i32_1 = arith.constant 0 : i32
    return %c0_i32, %c0_i32_0 : i32, i32
  }
  func.func @transform_6(%arg0: i32, %arg1: i32) -> (i32, i32) {
    %c0_i32 = arith.constant 0 : i32
    %c0_i32_0 = arith.constant 0 : i32
    %c0_i32_1 = arith.constant 0 : i32
    return %c0_i32, %c0_i32_0 : i32, i32
  }
  func.func @transform_7(%arg0: i32, %arg1: i32) -> (i32, i32) {
    %c0_i32 = arith.constant 0 : i32
    %c0_i32_0 = arith.constant 0 : i32
    %c0_i32_1 = arith.constant 0 : i32
    return %c0_i32, %c0_i32_0 : i32, i32
  }
  func.func @transform_8(%arg0: i32, %arg1: i32) -> (i32, i32, i32) {
    %c0_i32 = arith.constant 0 : i32
    %c0_i32_0 = arith.constant 0 : i32
    return %arg0, %c0_i32, %arg1 : i32, i32, i32
  }
}

</mosaic_0001>

<bundles_post_ra>
// kernel: tpu_custom_call.1
= control target key start
LH: loop header
LB: loop body
LE: loop exit
PB: predicated region body
PF: predicated region fallthrough
CT: control target
= control target key end

     0   :  { %13 = vsyncpa [#allocation3], 0  ;;  %s3506_s0 = inlined_call_operand.vmem [shape: f32[2,64,256], index: 0, kind: input, shape index: {}]   ;;  %s3507_s1 = inlined_call_operand.vmem [shape: f32[2,64,256], index: 1, kind: input, shape index: {}]   ;;  %s3508_s2 = inlined_call_operand.vmem [shape: bf16[256,64], index: 2, kind: input, shape index: {}]   ;;  %s3509_s3 = inlined_call_operand.vmem [shape: f32[256,1], index: 3, kind: input, shape index: {}]   ;;  %s3510_s4 = inlined_call_operand.vmem [shape: bf16[128,256], index: 4, kind: input, shape index: {}]   ;;  %s3511_s5 = inlined_call_operand.vmem [shape: f32[128,1], index: 5, kind: input, shape index: {}]   ;;  %s3512_s6 = inlined_call_operand.vmem [shape: f32[64,1], index: 6, kind: input, shape index: {}]   ;;  %s3513_s7 = inlined_call_operand.vmem [shape: f32[64,1], index: 7, kind: input, shape index: {}]   ;;  %s3514_s8 = inlined_call_operand.hbm [shape: f32[2,64,256], index: 8, kind: output, shape index: {}]  }
   0x1   :  { %15 = vsyncpa [#allocation3 + $0x1], 0  ;;  %s2485_s27 = smov 0   ;;  %s2487_s28 = smov 0  }
   0x2   :  { %s2489_s29 = smov 0   ;;  %s2491_s30 = smov 0  }
   0x3   :  { %s2493_s9 = smov 0   ;;  %s2495_s10 = smov 0  }
   0x4 LB: > { %s1926_s11 = sadd.s32 4294967295, %s2435_s10   ;;  %s1927_s12 = sadd.s32 4294967294, %s2435_s10   ;;  %s2435_s10 = sphi %s2495_s10, %s21_s10   ;;  %s2431_s9 = sphi %s2493_s9, %s3521_s9   ;;  %s2427_s30 = sphi %s2491_s30, %s3520_s30   ;;  %s2423_s29 = sphi %s2489_s29, %s3519_s29   ;;  %s2419_s28 = sphi %s2487_s28, %s3518_s28   ;;  %s2415_s27 = sphi %s2485_s27, %s3517_s27  }
   0x5   : > { %s33_s13 = sadd.s32 1, %s2431_s9  ;;  %s224_s14 = sadd.s32 1, %s2423_s29 }
   0x6   : > { %p35_p0 = scmp.ge.s32.totalorder %s33_s13, 2  ;;  %p234_p1 = scmp.ne.s32.totalorder %s2423_s29, %s2419_s28 }
   0x7   : > { %p235_p2 = scmp.eq.s32.totalorder %s1926_s11, 1  ;;  %p240_p3 = scmp.ne.s32.totalorder %s2419_s28, %s2415_s27 }
   0x8   : > { %s3523_s13 = smov (%p35_p0, %s33_s13), 0  ;;  %p241_p5 = scmp.eq.s32.totalorder %s1927_s12, 1 }
   0x9   : > { %p2525_p4 = por %p235_p2, %p234_p1  ;;  %s219_s16 = ssub.s32 %s2431_s9, %s3523_s13 }
   0xa   : > { %p1930_p6 = scmp.ge.s32.totalorder %s2435_s10, 1  ;;  %p222_p7 = scmp.eq.s32.totalorder %s219_s16, 0 }
   0xb   : > { %p2532_p8 = por %p241_p5, %p240_p3  ;;  %p303_p9 = scmp.lt.s32.totalorder %s2435_s10, 3 }
   0xc   : > { %s2538_s18 = scalar_select %p222_p7, %s2423_s29, %s224_s14  }
   0xd   : > { %p304_p10 = pnand %p1930_p6, %p303_p9 }
   0xe   : > { %p351_p11 = scmp.lt.s32.totalorder (!%p304_p10), %s2427_s30, 1  ;;  %s347_s14 = sand.u32 (!%p304_p10), 1, %s2419_s28  }
   0xf   : > { %307 = sbr.rel (%p304_p10) target bundleno = 872 (0x368), region = 52  ;;  %s1931_s16 = sshll.u32 (!%p304_p10), %s347_s14, 7 }
  0x10   : > { %s3325_s20 = scalar_lea.vmem (!%p304_p10), [#allocation2], %s1931_s16  ;;  %s2135_s21 = sshll.u32 (!%p304_p10), %s2427_s30, 7 }
  0x11   : > { %s1826_s11 = sshll.u32 (!%p304_p10), %s3325_s20, 4  ;;  %s1827_s11 = int_to_ptr.vmem [resolvable:$true] %s1826_s11 }
  0x14   : > { %v434_v0 = vld [vmem:[%s3509_s3 + $0xf0] sm:$0xff]  ;;  %v416_v2 = vld [vmem:[%s3509_s3 + $0x60] sm:$0xff]  ;;  %v2437_v3 = vmov 0   ;;  %s352_s25 = scalar_select %p351_p11, %s2427_s30, 1  ;;  %v435_v4 = vld [vmem:[%s3509_s3 + $0xf8] sm:$0xff]  ;;  %vm780_vm0 = vcmask 523264  }
  0x15   : > { %v418_v1 = vld [vmem:[%s3509_s3 + $0x70] sm:$0xff]  ;;  %2196 = vset.pattern.permute.xlu2 %v2437_v3  ;;  %2195 = vset.pattern.permute.xlu1 %v2437_v3  ;;  %v419_v5 = vld [vmem:[%s3509_s3 + $0x78] sm:$0xff]  ;;  %v417_v6 = vld [vmem:[%s3509_s3 + $0x68] sm:$0xff]  ;;  %s1812_s30 = scalar_lea.sflag [#allocation3], %s347_s14 }
  0x16   : > { %2194 = vset.pattern.permute.xlu0 %v2437_v3  ;;  %692 = vperm.xlu1 %2195, %v434_v0   ;;  %s2101_s26 = sshll.u32 %s352_s25, 7  ;;  %v433_v39 = vld [vmem:[%s3509_s3 + $0xe8] sm:$0xff]  ;;  %v432_v46 = vld [vmem:[%s3509_s3 + $0xe0] sm:$0xff]  ;;  %v414_v55 = vld [vmem:[%s3509_s3 + $0x50] sm:$0xff]  ;;  %s1825_s25 = scalar_lea.hbm %s3514_s8, %s2135_s21 }
  0x17   : > { %612 = vperm.xlu0 %2194, %v418_v1   ;;  %602 = vperm.xlu2 %2196, %v416_v2   ;;  %s2557_s19 = scalar_lea.vmem %s3506_s0, %s2101_s26  ;;  %s2562_s22 = scalar_lea.vmem %s3507_s1, %s2101_s26  ;;  %v430_v2 = vld [vmem:[%s3509_s3 + $0xd0] sm:$0xff]  ;;  %v415_v3 = vld [vmem:[%s3509_s3 + $0x58] sm:$0xff] }
  0x18   : > { %v496_v7 = vld [vmem:[%s2557_s19 + $0x60] sm:$0xff]  ;;  %v498_v8 = vld [vmem:[%s2557_s19 + $0x70] sm:$0xff]  ;;  %v497_v12 = vld [vmem:[%s2557_s19 + $0x68] sm:$0xff]  ;;  %s1828_s26 = sshll.u32 %s1825_s25, 4  ;;  %s2377_s21 = scalar_lea.hbm %s3514_s8, 256  ;;  %s1829_s26 = int_to_ptr.hbm [resolvable:$true] %s1828_s26 }
  0x19   : > { %v512_v9 = vld [vmem:[%s2562_s22 + $0x60] sm:$0xff]  ;;  %v514_v10 = vld [vmem:[%s2562_s22 + $0x70] sm:$0xff]  ;;  %v499_v13 = vld [vmem:[%s2557_s19 + $0x78] sm:$0xff] }
  0x1a   : > { %v528_v11 = vadd.f32 %v512_v9, %v496_v7  ;;  %v530_v14 = vadd.f32 %v514_v10, %v498_v8  ;;  %v513_v15 = vld [vmem:[%s2562_s22 + $0x68] sm:$0xff]  ;;  %v515_v16 = vld [vmem:[%s2562_s22 + $0x78] sm:$0xff]  ;;  %v492_v17 = vld [vmem:[%s2557_s19 + $0x40] sm:$0xff] }
  0x1b   : > { %v529_v18 = vadd.f32 %v513_v15, %v497_v12  ;;  %v531_v19 = vadd.f32 %v515_v16, %v499_v13  ;;  %v494_v20 = vld [vmem:[%s2557_s19 + $0x50] sm:$0xff]  ;;  %v508_v21 = vld [vmem:[%s2562_s22 + $0x40] sm:$0xff]  ;;  %v493_v26 = vld [vmem:[%s2557_s19 + $0x48] sm:$0xff] }
  0x1c   : > { %v510_v22 = vld [vmem:[%s2562_s22 + $0x50] sm:$0xff]  ;;  %v538_v23 = vpack.c.bf16 %v530_v14, %v528_v11  ;;  %v524_v24 = vadd.f32 %v508_v21, %v492_v17  ;;  %v495_v27 = vld [vmem:[%s2557_s19 + $0x58] sm:$0xff]  ;;  %v509_v28 = vld [vmem:[%s2562_s22 + $0x48] sm:$0xff] }
  0x1d   : > { %v526_v25 = vadd.f32 %v510_v22, %v494_v20  ;;  %v539_v29 = vpack.c.bf16 %v531_v19, %v529_v18  ;;  %v511_v30 = vld [vmem:[%s2562_s22 + $0x58] sm:$0xff]  ;;  %v525_v31 = vadd.f32 %v509_v28, %v493_v26  ;;  %v488_v32 = vld [vmem:[%s2557_s19 + $0x20] sm:$0xff]  ;;  %v490_v33 = vld [vmem:[%s2557_s19 + $0x30] sm:$0xff] }
  0x1e   : > { %697 = vperm.xlu1 %2195, %v435_v4   ;;  %833 = vmatpush.bf16.msra.mxu0 %v538_v23  ;;  %v527_v35 = vadd.f32 %v511_v30, %v495_v27  ;;  %v504_v36 = vld [vmem:[%s2562_s22 + $0x20] sm:$0xff]  ;;  %v506_v37 = vld [vmem:[%s2562_s22 + $0x30] sm:$0xff]  ;;  %v489_v38 = vld [vmem:[%s2557_s19 + $0x28] sm:$0xff] }
  0x1f   : > { %617 = vperm.xlu0 %2194, %v419_v5   ;;  %607 = vperm.xlu2 %2196, %v417_v6   ;;  %v536_v34 = vpack.c.bf16 %v526_v25, %v524_v24  ;;  %v520_v40 = vadd.f32 %v504_v36, %v488_v32  ;;  %v522_v41 = vadd.f32 %v506_v37, %v490_v33  ;;  %v491_v42 = vld [vmem:[%s2557_s19 + $0x38] sm:$0xff]  ;;  %v505_v43 = vld [vmem:[%s2562_s22 + $0x28] sm:$0xff]  ;;  %v484_v49 = vld [vmem:[%s2557_s19] sm:$0xff] }
  0x20   : > { %922 = vmatpush.bf16.msra.mxu1 %v539_v29  ;;  %v507_v44 = vld [vmem:[%s2562_s22 + $0x38] sm:$0xff]  ;;  %v537_v45 = vpack.c.bf16 %v527_v35, %v525_v31  ;;  %v521_v47 = vadd.f32 %v505_v43, %v489_v38  ;;  %v486_v50 = vld [vmem:[%s2557_s19 + $0x10] sm:$0xff]  ;;  %v500_v51 = vld [vmem:[%s2562_s22] sm:$0xff] }
  0x21   : > { %v523_v48 = vadd.f32 %v507_v44, %v491_v42  ;;  %v502_v52 = vld [vmem:[%s2562_s22 + $0x10] sm:$0xff]  ;;  %v485_v53 = vld [vmem:[%s2557_s19 + $0x8] sm:$0xff]  ;;  %v487_v54 = vld [vmem:[%s2557_s19 + $0x18] sm:$0xff]  ;;  %v534_v56 = vpack.c.bf16 %v522_v41, %v520_v40  ;;  %v516_v57 = vadd.f32 %v500_v51, %v484_v49 }
  0x22   : > { %834 = vmatpush.bf16.msra.mxu0 %v536_v34  ;;  %v518_v58 = vadd.f32 %v502_v52, %v486_v50  ;;  %v501_v59 = vld [vmem:[%s2562_s22 + $0x8] sm:$0xff]  ;;  %v503_v60 = vld [vmem:[%s2562_s22 + $0x18] sm:$0xff]  ;;  %v2103_v5 = vld [vmem:[%s3508_s2] sm:$0xff] }
  0x23   : > { %v535_v61 = vpack.c.bf16 %v523_v48, %v521_v47  ;;  %v517_v62 = vadd.f32 %v501_v59, %v485_v53  ;;  %v519_v63 = vadd.f32 %v503_v60, %v487_v54  ;;  %v431_v4 = vld [vmem:[%s3509_s3 + $0xd8] sm:$0xff]  ;;  %v413_v6 = vld [vmem:[%s3509_s3 + $0x48] sm:$0xff]  ;;  %v428_v7 = vld [vmem:[%s3509_s3 + $0xc0] sm:$0xff] }
  0x24   : > { %923 = vmatpush.bf16.msra.mxu1 %v537_v45  ;;  %v532_v0 = vpack.c.bf16 %v518_v58, %v516_v57  ;;  %v412_v8 = vld [vmem:[%s3509_s3 + $0x40] sm:$0xff]  ;;  %v410_v9 = vld [vmem:[%s3509_s3 + $0x30] sm:$0xff]  ;;  %v429_v10 = vld [vmem:[%s3509_s3 + $0xc8] sm:$0xff] }
  0x25   : > { %v533_v1 = vpack.c.bf16 %v519_v63, %v517_v62  ;;  %v411_v11 = vld [vmem:[%s3509_s3 + $0x38] sm:$0xff]  ;;  %v2104_v12 = vld [vmem:[%s3508_s2 + $0x8] sm:$0xff]  ;;  %v426_v14 = vld [vmem:[%s3509_s3 + $0xb0] sm:$0xff] }
  0x26   : > { %687 = vperm.xlu1 %2195, %v433_v39   ;;  %835 = vmatpush.bf16.msra.mxu0 %v534_v56  ;;  %v427_v13 = vld [vmem:[%s3509_s3 + $0xb8] sm:$0xff]  ;;  %v408_v15 = vld [vmem:[%s3509_s3 + $0x20] sm:$0xff]  ;;  %v409_v17 = vld [vmem:[%s3509_s3 + $0x28] sm:$0xff] }
  0x27   : > { %682 = vperm.xlu0 %2194, %v432_v46   ;;  %592 = vperm.xlu2 %2196, %v414_v55   ;;  %v424_v16 = vld [vmem:[%s3509_s3 + $0xa0] sm:$0xff]  ;;  %v425_v18 = vld [vmem:[%s3509_s3 + $0xa8] sm:$0xff]  ;;  %v2105_v19 = vld [vmem:[%s3508_s2 + $0x10] sm:$0xff] }
  0x28   : > { %924 = vmatpush.bf16.msra.mxu1 %v535_v61  ;;  %v407_v20 = vld [vmem:[%s3509_s3 + $0x18] sm:$0xff]  ;;  %v422_v21 = vld [vmem:[%s3509_s3 + $0x90] sm:$0xff]  ;;  %v404_v23 = vld [vmem:[%s3509_s3] sm:$0xff] }
  0x29   : > { %v406_v22 = vld [vmem:[%s3509_s3 + $0x10] sm:$0xff]  ;;  %v405_v24 = vld [vmem:[%s3509_s3 + $0x8] sm:$0xff]  ;;  %v2106_v25 = vld [vmem:[%s3508_s2 + $0x18] sm:$0xff] }
  0x2a   : > { %836 = vmatpush.bf16.msra.mxu0 %v532_v0  ;;  %v2107_v26 = vld [vmem:[%s3508_s2 + $0x20] sm:$0xff]  ;;  %v423_v28 = vld [vmem:[%s3509_s3 + $0x98] sm:$0xff]  ;;  %v2108_v30 = vld [vmem:[%s3508_s2 + $0x28] sm:$0xff] }
  0x2b   : > { %v420_v31 = vld [vmem:[%s3509_s3 + $0x80] sm:$0xff]  ;;  %v2109_v35 = vld [vmem:[%s3508_s2 + $0x30] sm:$0xff]  ;;  %v469_v36 = vld [vmem:[%s3511_s5 + $0x8] sm:$0xff] }
  0x2c   : > { %925 = vmatpush.bf16.msra.mxu1 %v533_v1  ;;  %v421_v37 = vld [vmem:[%s3509_s3 + $0x88] sm:$0xff]  ;;  %v472_v41 = vld [vmem:[%s3511_s5 + $0x20] sm:$0xff]  ;;  %v470_v42 = vld [vmem:[%s3511_s5 + $0x10] sm:$0xff] }
  0x2d   : > { %2000 = vmatmul.msk.bf16.vlgmr.msra.gmra.mxu0 %vm780_vm0, %v2103_v5  ;;  %v2110_v46 = vld [vmem:[%s3508_s2 + $0x38] sm:$0xff]  ;;  %v473_v48 = vld [vmem:[%s3511_s5 + $0x28] sm:$0xff]  ;;  %v478_v52 = vld [vmem:[%s3511_s5 + $0x50] sm:$0xff] }
  0x2e   : > { %672 = vperm.xlu1 %2195, %v430_v2   ;;  %v475_v47 = vld [vmem:[%s3511_s5 + $0x38] sm:$0xff]  ;;  %v476_v53 = vld [vmem:[%s3511_s5 + $0x40] sm:$0xff]  ;;  %v481_v61 = vld [vmem:[%s3511_s5 + $0x68] sm:$0xff] }
  0x2f   : > { %597 = vperm.xlu0 %2194, %v415_v3   ;;  %677 = vperm.xlu2 %2196, %v431_v4   ;;  %v2111_v56 = vld [vmem:[%s3508_s2 + $0x40] sm:$0xff]  ;;  %v479_v62 = vld [vmem:[%s3511_s5 + $0x58] sm:$0xff] }
  0x30   : > { %2016 = vmatmul.msk.bf16.vlgmr.msra.gmra.mxu1 %vm780_vm0, %v2103_v5  ;;  %v468_v57 = vld [vmem:[%s3511_s5] sm:$0xff]  ;;  %v471_v1 = vld [vmem:[%s3511_s5 + $0x18] sm:$0xff]  ;;  %v482_v5 = vld [vmem:[%s3511_s5 + $0x70] sm:$0xff] }
  0x31   : > { %v436_v4 = vld [vmem:[%s3512_s6] sm:$0xff] }
  0x36   : > { %587 = vperm.xlu1 %2195, %v413_v6  }
  0x37   : > { %662 = vperm.xlu2 %2196, %v428_v7   ;;  %582 = vperm.xlu0 %2194, %v412_v8  }
  0x3d   : > { %2001 = vmatmul.msk.bf16.gmra.mxu0 %vm780_vm0, %v2104_v12 }
  0x3e   : > { %572 = vperm.xlu1 %2195, %v410_v9   ;;  %v474_v9 = vld [vmem:[%s3511_s5 + $0x30] sm:$0xff] }
  0x3f   : > { %667 = vperm.xlu0 %2194, %v429_v10   ;;  %577 = vperm.xlu2 %2196, %v411_v11   ;;  %v2112_v10 = vld [vmem:[%s3508_s2 + $0x48] sm:$0xff] }
  0x40   : > { %2017 = vmatmul.msk.bf16.gmra.mxu1 %vm780_vm0, %v2104_v12 }
  0x46   : > { %657 = vperm.xlu1 %2195, %v427_v13   ;;  %v439_v13 = vld [vmem:[%s3512_s6 + $0x18] sm:$0xff] }
  0x47   : > { %652 = vperm.xlu0 %2194, %v426_v14   ;;  %562 = vperm.xlu2 %2196, %v408_v15   ;;  %v437_v14 = vld [vmem:[%s3512_s6 + $0x8] sm:$0xff] }
  0x4d   : > { %2002 = vmatmul.msk.bf16.gmra.mxu0 %vm780_vm0, %v2105_v19 }
  0x4e   : > { %642 = vperm.xlu1 %2195, %v424_v16  }
  0x4f   : > { %567 = vperm.xlu0 %2194, %v409_v17   ;;  %647 = vperm.xlu2 %2196, %v425_v18   ;;  %v477_v18 = vld [vmem:[%s3511_s5 + $0x48] sm:$0xff] }
  0x50   : > { %2018 = vmatmul.msk.bf16.gmra.mxu1 %vm780_vm0, %v2105_v19 }
  0x56   : > { %557 = vperm.xlu1 %2195, %v407_v20  }
  0x57   : > { %632 = vperm.xlu2 %2196, %v422_v21   ;;  %552 = vperm.xlu0 %2194, %v406_v22   ;;  %v442_v21 = vld [vmem:[%s3512_s6 + $0x30] sm:$0xff]  ;;  %v440_v22 = vld [vmem:[%s3512_s6 + $0x20] sm:$0xff] }
  0x5d   : > { %2003 = vmatmul.msk.bf16.gmra.mxu0 %vm780_vm0, %v2106_v25 }
  0x5e   : > { %542 = vperm.xlu1 %2195, %v404_v23  }
  0x5f   : > { %547 = vperm.xlu2 %2196, %v405_v24   ;;  %637 = vperm.xlu0 %2194, %v423_v28   ;;  %v480_v28 = vld [vmem:[%s3511_s5 + $0x60] sm:$0xff] }
  0x60   : > { %2019 = vmatmul.msk.bf16.gmra.mxu1 %vm780_vm0, %v2106_v25 }
  0x66   : > { %627 = vperm.xlu1 %2195, %v421_v37  }
  0x67   : > { %622 = vperm.xlu0 %2194, %v420_v31   ;;  %1105 = vperm.xlu2 %2196, %v468_v57  }
  0x6d   : > { %2004 = vmatmul.msk.bf16.gmra.mxu0 %vm780_vm0, %v2107_v26 }
  0x6e   : > { %1115 = vperm.xlu1 %2195, %v470_v42   ;;  %v445_v42 = vld [vmem:[%s3513_s7 + $0x8] sm:$0xff] }
  0x6f   : > { %1110 = vperm.xlu0 %2194, %v469_v36   ;;  %1120 = vperm.xlu2 %2196, %v471_v1   ;;  %v2113_v36 = vld [vmem:[%s3508_s2 + $0x50] sm:$0xff] }
  0x70   : > { %2020 = vmatmul.msk.bf16.gmra.mxu1 %vm780_vm0, %v2107_v26 }
  0x71   : > { %v2696_v27 = vpop.permute.xlu2 %602 }
  0x76   : > { %1130 = vperm.xlu1 %2195, %v473_v48  }
  0x77   : > { %1125 = vperm.xlu0 %2194, %v472_v41   ;;  %1135 = vperm.xlu2 %2196, %v474_v9   ;;  %v446_v9 = vld [vmem:[%s3513_s7 + $0x10] sm:$0xff] }
  0x79   : > { %v2701_v29 = vpop.permute.xlu2 %607 }
  0x7d   : > { %2005 = vmatmul.msk.bf16.gmra.mxu0 %vm780_vm0, %v2108_v30 }
  0x7e   : > { %1145 = vperm.xlu1 %2195, %v476_v53  }
  0x7f   : > { %1140 = vperm.xlu0 %2194, %v475_v47   ;;  %1150 = vperm.xlu2 %2196, %v477_v18   ;;  %v2114_v18 = vld [vmem:[%s3508_s2 + $0x58] sm:$0xff] }
  0x80   : > { %2021 = vmatmul.msk.bf16.gmra.mxu1 %vm780_vm0, %v2108_v30 }
  0x81   : > { %v2711_v32 = vpop.permute.xlu2 %592 }
  0x86   : > { %1160 = vperm.xlu1 %2195, %v479_v62  }
  0x87   : > { %1155 = vperm.xlu0 %2194, %v478_v52   ;;  %1165 = vperm.xlu2 %2196, %v480_v28  }
  0x88   : > { %v2713_v33 = vpop.permute.xlu1 %692 }
  0x89   : > { %v2715_v34 = vpop.permute.xlu0 %612  ;;  %v2726_v38 = vpop.permute.xlu2 %677 }
  0x8d   : > { %2006 = vmatmul.msk.bf16.gmra.mxu0 %vm780_vm0, %v2109_v35 }
  0x8e   : > { %1175 = vperm.xlu1 %2195, %v482_v5  }
  0x8f   : > { %1170 = vperm.xlu0 %2194, %v481_v61  }
  0x90   : > { %2022 = vmatmul.msk.bf16.gmra.mxu1 %vm780_vm0, %v2109_v35  ;;  %v2730_v39 = vpop.permute.xlu1 %697 }
  0x91   : > { %v2732_v40 = vpop.permute.xlu0 %617  ;;  %v2744_v45 = vpop.permute.xlu2 %662 }
  0x96   : > { %1674 = vperm.xlu1 %2195, %v437_v14  }
  0x97   : > { %1669 = vperm.xlu0 %2194, %v436_v4  }
  0x98   : > { %v2740_v43 = vpop.permute.xlu1 %687 }
  0x99   : > { %v2742_v44 = vpop.permute.xlu0 %682  ;;  %v2761_v51 = vpop.permute.xlu2 %577 }
  0x9d   : > { %2007 = vmatmul.msk.bf16.gmra.mxu0 %vm780_vm0, %v2110_v46 }
  0x9e   : > { %1689 = vperm.xlu1 %2195, %v440_v22   ;;  %v451_v22 = vld [vmem:[%s3513_s7 + $0x38] sm:$0xff] }
  0x9f   : > { %1684 = vperm.xlu0 %2194, %v439_v13   ;;  %v438_v13 = vld [vmem:[%s3512_s6 + $0x10] sm:$0xff] }
  0xa0   : > { %2023 = vmatmul.msk.bf16.gmra.mxu1 %vm780_vm0, %v2110_v46  ;;  %v2757_v49 = vpop.permute.xlu1 %672  ;;  %v443_v46 = vld [vmem:[%s3512_s6 + $0x38] sm:$0xff] }
  0xa1   : > { %v2759_v50 = vpop.permute.xlu0 %597  ;;  %v2783_v60 = vpop.permute.xlu2 %562 }
  0xa6   : > { %1704 = vperm.xlu1 %2195, %v443_v46   ;;  %v444_v46 = vld [vmem:[%s3513_s7] sm:$0xff] }
  0xa7   : > { %1699 = vperm.xlu0 %2194, %v442_v21  }
  0xa8   : > { %v2769_v54 = vpop.permute.xlu1 %587 }
  0xa9   : > { %v2771_v55 = vpop.permute.xlu0 %582  ;;  %v2808_v6 = vpop.permute.xlu2 %647 }
  0xaa   : > { %v2779_v58 = vpop.f32.mrf.mxu0 }
  0xad   : > { %v2781_v59 = vpop.f32.mrf.mxu1  ;;  %2008 = vmatmul.msk.bf16.gmra.mxu0 %vm780_vm0, %v2111_v56 }
  0xae   : > { %1735 = vperm.xlu1 %2195, %v446_v9  }
  0xaf   : > { %1730 = vperm.xlu0 %2194, %v445_v42  }
  0xb0   : > { %2024 = vmatmul.msk.bf16.gmra.mxu1 %vm780_vm0, %v2111_v56  ;;  %v2793_v63 = vpop.permute.xlu1 %572  ;;  %v483_v56 = vld [vmem:[%s3511_s5 + $0x78] sm:$0xff] }
  0xb1   : > { %v2795_v0 = vpop.permute.xlu0 %667  ;;  %v2834_v17 = vpop.permute.xlu2 %632  ;;  %1180 = vperm.xlu2 %2196, %v483_v56  }
  0xb2   : > { %v840_v2 = vpop.f32.mrf.mxu0 }
  0xb5   : > { %v2800_v3 = vpop.f32.mrf.mxu1 }
  0xb8   : > { %v2810_v7 = vpop.permute.xlu1 %657 }
  0xb9   : > { %v2812_v8 = vpop.permute.xlu0 %652  ;;  %v2856_v31 = vpop.permute.xlu2 %547  ;;  %1679 = vperm.xlu2 %2196, %v438_v13  }
  0xba   : > { %v843_v11 = vpop.f32.mrf.mxu0  ;;  %v841_v48 = vadd.f32 %v840_v2, %v2856_v31 }
  0xbc   : > { %v1009_v57 = vmax.f32 %v841_v48, 0.0 }
  0xbd   : > { %v2820_v12 = vpop.f32.mrf.mxu1  ;;  %2009 = vmatmul.msk.bf16.gmra.mxu0 %vm780_vm0, %v2112_v10 }
  0xc0   : > { %2025 = vmatmul.msk.bf16.gmra.mxu1 %vm780_vm0, %v2112_v10  ;;  %v2830_v15 = vpop.permute.xlu1 %642 }
  0xc1   : > { %v2832_v16 = vpop.permute.xlu0 %567 }
  0xc2   : > { %v845_v19 = vpop.f32.mrf.mxu0 }
  0xc5   : > { %v2839_v20 = vpop.f32.mrf.mxu1 }
  0xc8   : > { %v2847_v23 = vpop.permute.xlu1 %557 }
  0xc9   : > { %v846_v24 = vadd.f32 %v845_v19, %v2847_v23  ;;  %v2850_v25 = vpop.permute.xlu0 %552 }
  0xca   : > { %v844_v26 = vadd.f32 %v843_v11, %v2850_v25  ;;  %v848_v37 = vpop.f32.mrf.mxu0 }
  0xcb   : > { %v1013_v30 = vmax.f32 %v846_v24, 0.0  ;;  %v849_v62 = vadd.f32 %v848_v37, %v2783_v60  ;;  %v449_v24 = vld [vmem:[%s3513_s7 + $0x28] sm:$0xff] }
  0xcc   : > { %v1011_v35 = vmax.f32 %v844_v26, 0.0  ;;  %1750 = vperm.xlu1 %2195, %v449_v24   ;;  %v441_v26 = vld [vmem:[%s3512_s6 + $0x28] sm:$0xff] }
  0xcd   : > { %v2861_v41 = vpop.f32.mrf.mxu1  ;;  %2010 = vmatmul.msk.bf16.gmra.mxu0 %vm780_vm0, %v2113_v36  ;;  %v1015_v10 = vmax.f32 %v849_v62, 0.0  ;;  %1694 = vperm.xlu2 %2196, %v441_v26  }
  0xce   : > { %v2869_v47 = vpack.c.bf16 %v1013_v30, %v1011_v35 }
  0xd0   : > { %2026 = vmatmul.msk.bf16.gmra.mxu1 %vm780_vm0, %v2113_v36  ;;  %v543_v52 = vpop.permute.xlu1 %542 }
  0xd1   : > { %v839_v53 = vadd.f32 %v2779_v58, %v543_v52  ;;  %v448_v58 = vld [vmem:[%s3513_s7 + $0x20] sm:$0xff] }
  0xd2   : > { %v850_v1 = vpop.f32.mrf.mxu0  ;;  %1745 = vperm.xlu0 %2194, %v448_v58   ;;  %v2116_v58 = vld [vmem:[%s3508_s2 + $0x68] sm:$0xff] }
  0xd3   : > { %v1007_v61 = vmax.f32 %v839_v53, 0.0  ;;  %v851_v5 = vadd.f32 %v850_v1, %v2832_v16  ;;  %v2115_v53 = vld [vmem:[%s3508_s2 + $0x60] sm:$0xff] }
  0xd5   : > { %v2879_v4 = vpop.f32.mrf.mxu1  ;;  %v2881_v2 = vpack.c.bf16 %v1009_v57, %v1007_v61  ;;  %v1017_v11 = vmax.f32 %v851_v5, 0.0  ;;  %1725 = vperm.xlu2 %2196, %v444_v46   ;;  %v447_v61 = vld [vmem:[%s3513_s7 + $0x18] sm:$0xff]  ;;  %v450_v5 = vld [vmem:[%s3513_s7 + $0x30] sm:$0xff] }
  0xd7   : > { %v2893_v14 = vpack.c.bf16 %v1017_v11, %v1015_v10 }
  0xda   : > { %v853_v19 = vpop.f32.mrf.mxu0  ;;  %1760 = vperm.xlu0 %2194, %v451_v22   ;;  %v2117_v22 = vld [vmem:[%s3508_s2 + $0x70] sm:$0xff] }
  0xdb   : > { %v854_v28 = vadd.f32 %v853_v19, %v2793_v63  ;;  %v928_v19 = vadd.f32 %v2781_v59, %v543_v52  ;;  %v935_v59 = vadd.f32 %v2839_v20, %v2847_v23 }
  0xdd   : > { %v2898_v21 = vpop.f32.mrf.mxu1  ;;  %2011 = vmatmul.msk.bf16.gmra.mxu0 %vm780_vm0, %v2114_v18  ;;  %v1019_v37 = vmax.f32 %v854_v28, 0.0  ;;  %1740 = vperm.xlu2 %2196, %v447_v61  }
  0xe0   : > { %2027 = vmatmul.msk.bf16.gmra.mxu1 %vm780_vm0, %v2114_v18  ;;  %v930_v18 = vadd.f32 %v2800_v3, %v2856_v31  ;;  %v933_v3 = vadd.f32 %v2820_v12, %v2850_v25  ;;  %v2118_v31 = vld [vmem:[%s3508_s2 + $0x78] sm:$0xff] }
  0xe2   : > { %v855_v30 = vpop.f32.mrf.mxu0  ;;  %v1010_v28 = vmax.f32 %v930_v18, 0.0  ;;  %v1012_v61 = vmax.f32 %v933_v3, 0.0 }
  0xe3   : > { %v856_v36 = vadd.f32 %v855_v30, %v2761_v51  ;;  %v1008_v30 = vmax.f32 %v928_v19, 0.0 }
  0xe5   : > { %v2912_v35 = vpop.f32.mrf.mxu1  ;;  %v1021_v42 = vmax.f32 %v856_v36, 0.0  ;;  %1755 = vperm.xlu2 %2196, %v450_v5   ;;  %v2956_v36 = vpack.c.bf16 %v1010_v28, %v1008_v30  ;;  %v938_v28 = vadd.f32 %v2861_v41, %v2783_v60  ;;  %v2977_v30 = vpop.permute.xlu0 %637 }
  0xe7   : > { %v2918_v48 = vpack.c.bf16 %v1021_v42, %v1019_v37 }
  0xea   : > { %v2923_v56 = vpop.f32.mrf.mxu0 }
  0xed   : > { %v2925_v57 = vpop.f32.mrf.mxu1  ;;  %2012 = vmatmul.msk.bf16.gmra.mxu0 %vm780_vm0, %v2115_v53 }
  0xf0   : > { %2028 = vmatmul.msk.bf16.gmra.mxu1 %vm780_vm0, %v2115_v53  ;;  %v1014_v53 = vmax.f32 %v935_v59, 0.0  ;;  %v940_v59 = vadd.f32 %v2879_v4, %v2832_v16  ;;  %v943_v16 = vadd.f32 %v2898_v21, %v2793_v63  ;;  %v945_v4 = vadd.f32 %v2912_v35, %v2761_v51 }
  0xf2   : > { %v860_v62 = vpop.f32.mrf.mxu0  ;;  %v2969_v5 = vpack.c.bf16 %v1014_v53, %v1012_v61  ;;  %v1016_v61 = vmax.f32 %v938_v28, 0.0  ;;  %v1022_v28 = vmax.f32 %v945_v4, 0.0 }
  0xf3   : > { %v861_v60 = vadd.f32 %v860_v62, %v2769_v54  ;;  %v623_v62 = vpop.permute.xlu0 %622 }
  0xf5   : > { %v2932_v1 = vpop.f32.mrf.mxu1 }
  0xfa   : > { %v863_v9 = vpop.f32.mrf.mxu0 }
  0xfd   : > { %v2940_v10 = vpop.f32.mrf.mxu1  ;;  %2013 = vmatmul.msk.bf16.gmra.mxu0 %vm780_vm0, %v2116_v58 }
 0x100   : > { %2029 = vmatmul.msk.bf16.gmra.mxu1 %vm780_vm0, %v2116_v58 }
 0x102   : > { %v865_v11 = vpop.f32.mrf.mxu0 }
 0x103   : > { %v866_v3 = vadd.f32 %v865_v11, %v2759_v50 }
 0x105   : > { %v2944_v13 = vpop.f32.mrf.mxu1  ;;  %v1029_v41 = vmax.f32 %v866_v3, 0.0  ;;  %v628_v3 = vpop.permute.xlu1 %627 }
 0x10a   : > { %v868_v24 = vpop.f32.mrf.mxu0 }
 0x10b   : > { %v869_v18 = vadd.f32 %v868_v24, %v2696_v27 }
 0x10d   : > { %v2952_v26 = vpop.f32.mrf.mxu1  ;;  %2014 = vmatmul.msk.bf16.gmra.mxu0 %vm780_vm0, %v2117_v22  ;;  %v1031_v53 = vmax.f32 %v869_v18, 0.0 }
 0x110   : > { %2030 = vmatmul.msk.bf16.gmra.mxu1 %vm780_vm0, %v2117_v22 }
 0x112   : > { %v870_v37 = vpop.f32.mrf.mxu0 }
 0x113   : > { %v871_v12 = vadd.f32 %v870_v37, %v2701_v29  ;;  %v864_v37 = vadd.f32 %v863_v9, %v2711_v32  ;;  %v859_v9 = vadd.f32 %v2923_v56, %v2771_v55 }
 0x115   : > { %v2958_v42 = vpop.f32.mrf.mxu1  ;;  %v1027_v11 = vmax.f32 %v864_v37, 0.0 }
 0x117   : > { %v1081_v18 = vpack.c.bf16 %v1029_v41, %v1027_v11  ;;  %v958_v41 = vadd.f32 %v2952_v26, %v2696_v27  ;;  %v2120_v27 = vld [vmem:[%s3510_s4 + $0x4] sm:$0xf0] }
 0x11a   : > { %v873_v52 = vpop.f32.mrf.mxu0 }
 0x11b   : > { %v874_v58 = vadd.f32 %v873_v52, %v2715_v34 }
 0x11d   : > { %v962_v46 = vpop.f32.mrf.mxu1  ;;  %2015 = vmatmul.msk.bf16.gmra.mxu0 %vm780_vm0, %v2118_v31  ;;  %v1035_v19 = vmax.f32 %v874_v58, 0.0 }
 0x120   : > { %2031 = vmatmul.msk.bf16.gmra.mxu1 %vm780_vm0, %v2118_v31  ;;  %v1033_v31 = vmax.f32 %v871_v12, 0.0  ;;  %v1025_v12 = vmax.f32 %v861_v60, 0.0 }
 0x122   : > { %v875_v20 = vpop.f32.mrf.mxu0 }
 0x123   : > { %v876_v25 = vadd.f32 %v875_v20, %v2732_v40  ;;  %v1018_v20 = vmax.f32 %v940_v59, 0.0  ;;  %v1023_v59 = vmax.f32 %v859_v9, 0.0  ;;  %v953_v9 = vadd.f32 %v2940_v10, %v2711_v32 }
 0x125   : > { %v964_v23 = vpop.f32.mrf.mxu1  ;;  %v1037_v22 = vmax.f32 %v876_v25, 0.0  ;;  %v1083_v25 = vpack.c.bf16 %v1033_v31, %v1031_v53  ;;  %v1079_v51 = vpack.c.bf16 %v1025_v12, %v1023_v59  ;;  %v950_v12 = vadd.f32 %v2932_v1, %v2769_v54 }
 0x127   : > { %v1085_v52 = vpack.c.bf16 %v1037_v22, %v1035_v19  ;;  %v2992_v19 = vpack.c.bf16 %v1018_v20, %v1016_v61  ;;  %v1020_v22 = vmax.f32 %v943_v16, 0.0  ;;  %v963_v61 = vadd.f32 %v962_v46, %v2715_v34  ;;  %v2034_v34 = vld [vmem:[%s3510_s4] sm:$0xf] }
 0x128   : > { %v965_v20 = vadd.f32 %v964_v23, %v2732_v40  ;;  %v1032_v40 = vmax.f32 %v958_v41, 0.0  ;;  %v3019_v46 = vor.u32 %v2120_v27, %v2034_v34  ;;  %v1026_v59 = vmax.f32 %v950_v12, 0.0  ;;  %v2042_v41 = vld [vmem:[%s3510_s4 + $0x10] sm:$0xf] }
 0x129   : > { %1263 = vmatpush.bf16.msra.mxu2 %v1085_v52  ;;  %v2994_v35 = vpack.c.bf16 %v1022_v28, %v1020_v22  ;;  %v1036_v16 = vmax.f32 %v963_v61, 0.0 }
 0x12a   : > { %v878_v24 = vpop.f32.mrf.mxu0  ;;  %v1038_v4 = vmax.f32 %v965_v20, 0.0 }
 0x12b   : > { %v879_v31 = vadd.f32 %v878_v24, %v623_v62 }
 0x12c   : > { %v1086_v32 = vpack.c.bf16 %v1038_v4, %v1036_v16 }
 0x12d   : > { %v2983_v58 = vpop.f32.mrf.mxu1  ;;  %1264 = vmatpush.bf16.msra.mxu2 %v1083_v25  ;;  %v1039_v56 = vmax.f32 %v879_v31, 0.0  ;;  %v960_v25 = vadd.f32 %v2958_v42, %v2701_v29  ;;  %v955_v29 = vadd.f32 %v2944_v13, %v2759_v50  ;;  %v1028_v50 = vmax.f32 %v953_v9, 0.0 }
 0x12f   : > { %v1030_v13 = vmax.f32 %v955_v29, 0.0 }
 0x131   : > { %1265 = vmatpush.bf16.msra.mxu2 %v1081_v18 }
 0x132   : > { %v880_v63 = vpop.f32.mrf.mxu0 }
 0x133   : > { %v881_v52 = vadd.f32 %v880_v63, %v628_v3 }
 0x135   : > { %v969_v21 = vpop.f32.mrf.mxu1  ;;  %v1041_v37 = vmax.f32 %v881_v52, 0.0  ;;  %1266 = vmatpush.bf16.msra.mxu2 %v1079_v51 }
 0x137   : > { %v2996_v53 = vpack.c.bf16 %v1041_v37, %v1039_v56 }
 0x139   : > { %1267 = vmatpush.bf16.msra.mxu2 %v2918_v48 }
 0x13a   : > { %v883_v60 = vpop.f32.mrf.mxu0 }
 0x13b   : > { %v884_v48 = vadd.f32 %v883_v60, %v2834_v17 }
 0x13d   : > { %v972_v24 = vpop.f32.mrf.mxu1  ;;  %1268 = vmatpush.bf16.msra.mxu2 %v2893_v14  ;;  %v1034_v14 = vmax.f32 %v960_v25, 0.0  ;;  %v1043_v23 = vmax.f32 %v884_v48, 0.0 }
 0x13e   : > { %v973_v52 = vadd.f32 %v972_v24, %v2834_v17  ;;  %v2122_v17 = vld [vmem:[%s3510_s4 + $0x14] sm:$0xf0] }
 0x13f   : > { %v1084_v18 = vpack.c.bf16 %v1034_v14, %v1032_v40  ;;  %v2124_v14 = vld [vmem:[%s3510_s4 + $0x24] sm:$0xf0] }
 0x140   : > { %v1044_v61 = vmax.f32 %v973_v52, 0.0 }
 0x141   : > { %1269 = vmatpush.bf16.msra.mxu2 %v2869_v47  ;;  %v948_v47 = vadd.f32 %v2925_v57, %v2771_v55  ;;  %v1082_v55 = vpack.c.bf16 %v1030_v13, %v1028_v50  ;;  %v968_v57 = vadd.f32 %v2983_v58, %v623_v62  ;;  %v2126_v13 = vld [vmem:[%s3510_s4 + $0x34] sm:$0xf0] }
 0x142   : > { %v885_v26 = vpop.f32.mrf.mxu0 }
 0x143   : > { %v886_v10 = vadd.f32 %v885_v26, %v2977_v30  ;;  %v1024_v28 = vmax.f32 %v948_v47, 0.0  ;;  %v1040_v56 = vmax.f32 %v968_v57, 0.0 }
 0x145   : > { %v974_v42 = vpop.f32.mrf.mxu1  ;;  %v1045_v11 = vmax.f32 %v886_v10, 0.0  ;;  %1270 = vmatpush.bf16.msra.mxu2 %v2881_v2  ;;  %v970_v2 = vadd.f32 %v969_v21, %v628_v3  ;;  %v1080_v51 = vpack.c.bf16 %v1026_v59, %v1024_v28 }
 0x146   : > { %v975_v54 = vadd.f32 %v974_v42, %v2977_v30 }
 0x147   : > { %v3026_v22 = vpack.c.bf16 %v1045_v11, %v1043_v23  ;;  %v1042_v37 = vmax.f32 %v970_v2, 0.0 }
 0x148   : > { %1271 = vmatmul.bf16.vlgmr.msra.gmra.mxu2 %v3019_v46  ;;  %v1046_v20 = vmax.f32 %v975_v54, 0.0 }
 0x149   : > { %1361 = vmatpush.bf16.msrb.mxu2 %v1086_v32  ;;  %v3044_v25 = vpack.c.bf16 %v1042_v37, %v1040_v56  ;;  %v2130_v56 = vld [vmem:[%s3510_s4 + $0x54] sm:$0xf0] }
 0x14a   : > { %v888_v31 = vpop.f32.mrf.mxu0  ;;  %v3042_v24 = vpack.c.bf16 %v1046_v20, %v1044_v61 }
 0x14b   : > { %v889_v60 = vadd.f32 %v888_v31, %v2830_v15 }
 0x14d   : > { %v977_v63 = vpop.f32.mrf.mxu1  ;;  %1362 = vmatpush.bf16.msrb.mxu2 %v1084_v18  ;;  %v1047_v16 = vmax.f32 %v889_v60, 0.0 }
 0x14e   : > { %v978_v1 = vadd.f32 %v977_v63, %v2830_v15  ;;  %v3046_v15 = vor.u32 %v2122_v17, %v2042_v41  ;;  %v2066_v63 = vld [vmem:[%s3510_s4 + $0x40] sm:$0xf] }
 0x14f   : > { %v2082_v17 = vld [vmem:[%s3510_s4 + $0x60] sm:$0xf] }
 0x150   : > { %v1048_v58 = vmax.f32 %v978_v1, 0.0 }
 0x151   : > { %1363 = vmatpush.bf16.msrb.mxu2 %v1082_v55  ;;  %v2128_v55 = vld [vmem:[%s3510_s4 + $0x44] sm:$0xf0] }
 0x152   : > { %v890_v30 = vpop.f32.mrf.mxu0  ;;  %v3091_v2 = vor.u32 %v2128_v55, %v2066_v63 }
 0x153   : > { %v891_v3 = vadd.f32 %v890_v30, %v2808_v6 }
 0x155   : > { %v979_v62 = vpop.f32.mrf.mxu1  ;;  %1364 = vmatpush.bf16.msrb.mxu2 %v1080_v51  ;;  %v1049_v4 = vmax.f32 %v891_v3, 0.0  ;;  %v2074_v51 = vld [vmem:[%s3510_s4 + $0x50] sm:$0xf] }
 0x156   : > { %v980_v21 = vadd.f32 %v979_v62, %v2808_v6  ;;  %v3102_v61 = vor.u32 %v2130_v56, %v2074_v51  ;;  %v2119_v56 = vld [vmem:[%s3510_s4 + $0x4] sm:$0xf] }
 0x157   : > { %v3049_v48 = vpack.c.bf16 %v1049_v4, %v1047_v16 }
 0x158   : > { %v1050_v9 = vmax.f32 %v980_v21, 0.0  ;;  %1276 = vmatmul.bf16.gmra.mxu2 %v3046_v15 }
 0x159   : > { %1365 = vmatpush.bf16.msrb.mxu2 %v2994_v35  ;;  %v2050_v35 = vld [vmem:[%s3510_s4 + $0x20] sm:$0xf] }
 0x15a   : > { %v3051_v34 = vpack.c.bf16 %v1050_v9, %v1048_v58  ;;  %v893_v27 = vpop.f32.mrf.mxu0  ;;  %v3067_v10 = vor.u32 %v2124_v14, %v2050_v35  ;;  %v2132_v58 = vld [vmem:[%s3510_s4 + $0x64] sm:$0xf0] }
 0x15b   : > { %v894_v40 = vadd.f32 %v893_v27, %v2812_v8  ;;  %v3114_v21 = vor.u32 %v2132_v58, %v2082_v17 }
 0x15d   : > { %v982_v29 = vpop.f32.mrf.mxu1  ;;  %1366 = vmatpush.bf16.msrb.mxu2 %v2992_v19 }
 0x15e   : > { %v983_v6 = vadd.f32 %v982_v29, %v2812_v8  ;;  %v1051_v8 = vmax.f32 %v894_v40, 0.0 }
 0x160   : > { %v1052_v32 = vmax.f32 %v983_v6, 0.0 }
 0x161   : > { %1367 = vmatpush.bf16.msrb.mxu2 %v2969_v5 }
 0x162   : > { %v895_v26 = vpop.f32.mrf.mxu0 }
 0x163   : > { %v896_v19 = vadd.f32 %v895_v26, %v2810_v7 }
 0x165   : > { %v984_v42 = vpop.f32.mrf.mxu1  ;;  %1368 = vmatpush.bf16.msrb.mxu2 %v2956_v36  ;;  %v1053_v47 = vmax.f32 %v896_v19, 0.0  ;;  %v2058_v36 = vld [vmem:[%s3510_s4 + $0x30] sm:$0xf] }
 0x166   : > { %v985_v5 = vadd.f32 %v984_v42, %v2810_v7  ;;  %v3080_v28 = vor.u32 %v2126_v13, %v2058_v36  ;;  %v2090_v13 = vld [vmem:[%s3510_s4 + $0x70] sm:$0xf] }
 0x167   : > { %v1093_v11 = vpack.c.bf16 %v1053_v47, %v1051_v8 }
 0x168   : > { %v1054_v23 = vmax.f32 %v985_v5, 0.0  ;;  %1281 = vmatmul.bf16.gmra.mxu2 %v3067_v10 }
 0x16a   : > { %v3069_v12 = vpack.c.bf16 %v1054_v23, %v1052_v32  ;;  %v898_v50 = vpop.f32.mrf.mxu0 }
 0x16b   : > { %v899_v19 = vadd.f32 %v898_v50, %v2744_v45 }
 0x16d   : > { %v3078_v18 = vpop.f32.mrf.mxu1  ;;  %v1055_v36 = vmax.f32 %v899_v19, 0.0  ;;  %v3224_v19 = vpop.permute.xlu2 %1105 }
 0x16e   : > { %v988_v17 = vadd.f32 %v3078_v18, %v2744_v45  ;;  %v2121_v45 = vld [vmem:[%s3510_s4 + $0x14] sm:$0xf] }
 0x172   : > { %v900_v7 = vpop.f32.mrf.mxu0 }
 0x173   : > { %v901_v26 = vadd.f32 %v900_v7, %v2795_v0 }
 0x175   : > { %v3083_v31 = vpop.f32.mrf.mxu1  ;;  %v1057_v8 = vmax.f32 %v901_v26, 0.0  ;;  %v2092_v26 = vld [vmem:[%s3510_s4 + $0x78] sm:$0xf0] }
 0x177   : > { %v1095_v7 = vpack.c.bf16 %v1057_v8, %v1055_v36 }
 0x178   : > { %1286 = vmatmul.bf16.gmra.mxu2 %v3080_v28 }
 0x17a   : > { %v903_v59 = vpop.f32.mrf.mxu0 }
 0x17b   : > { %v904_v35 = vadd.f32 %v903_v59, %v2757_v49  ;;  %v2134_v59 = vld [vmem:[%s3510_s4 + $0x74] sm:$0xf0] }
 0x17c   : > { %v3128_v63 = vor.u32 %v2134_v59, %v2090_v13 }
 0x17d   : > { %v3093_v52 = vpop.f32.mrf.mxu1  ;;  %v1059_v5 = vmax.f32 %v904_v35, 0.0 }
 0x182   : > { %v905_v57 = vpop.f32.mrf.mxu0 }
 0x183   : > { %v906_v29 = vadd.f32 %v905_v57, %v2726_v38 }
 0x185   : > { %v994_v1 = vpop.f32.mrf.mxu1  ;;  %v1061_v42 = vmax.f32 %v906_v29, 0.0 }
 0x187   : > { %v1097_v23 = vpack.c.bf16 %v1061_v42, %v1059_v5 }
 0x188   : > { %1291 = vmatmul.bf16.gmra.mxu2 %v3091_v2 }
 0x18a   : > { %v908_v54 = vpop.f32.mrf.mxu0 }
 0x18b   : > { %v909_v16 = vadd.f32 %v908_v54, %v2742_v44 }
 0x18d   : > { %v997_v60 = vpop.f32.mrf.mxu1  ;;  %v1063_v14 = vmax.f32 %v909_v16, 0.0 }
 0x192   : > { %v910_v37 = vpop.f32.mrf.mxu0 }
 0x193   : > { %v911_v62 = vadd.f32 %v910_v37, %v2740_v43  ;;  %v2036_v37 = vld [vmem:[%s3510_s4 + $0x8] sm:$0xf0] }
 0x195   : > { %v999_v4 = vpop.f32.mrf.mxu1  ;;  %v1065_v6 = vmax.f32 %v911_v62, 0.0  ;;  %v2068_v62 = vld [vmem:[%s3510_s4 + $0x48] sm:$0xf0] }
 0x196   : > { %v1000_v54 = vadd.f32 %v999_v4, %v2740_v43  ;;  %v993_v43 = vadd.f32 %v3093_v52, %v2757_v49 }
 0x197   : > { %v1099_v32 = vpack.c.bf16 %v1065_v6, %v1063_v14  ;;  %v2084_v6 = vld [vmem:[%s3510_s4 + $0x68] sm:$0xf0] }
 0x198   : > { %1296 = vmatmul.bf16.gmra.mxu2 %v3102_v61 }
 0x19a   : > { %v913_v20 = vpop.f32.mrf.mxu0 }
 0x19b   : > { %v914_v41 = vadd.f32 %v913_v20, %v2713_v33  ;;  %v1066_v20 = vmax.f32 %v1000_v54, 0.0 }
 0x19d   : > { %v1067_v9 = vmax.f32 %v914_v41, 0.0  ;;  %v1002_v47 = vpop.f32.mrf.mxu1  ;;  %v3144_v41 = vor.u32 %v2119_v56, %v2036_v37 }
 0x19e   : > { %v1003_v57 = vadd.f32 %v1002_v47, %v2713_v33  ;;  %v3227_v47 = vpop.permute.xlu0 %1110 }
 0x1a2   : > { %v915_v30 = vpop.f32.mrf.mxu0 }
 0x1a3   : > { %v916_v3 = vadd.f32 %v915_v30, %v2730_v39 }
 0x1a5   : > { %v1069_v27 = vmax.f32 %v916_v3, 0.0  ;;  %v1004_v50 = vpop.f32.mrf.mxu1 }
 0x1a6   : > { %v1005_v55 = vadd.f32 %v1004_v50, %v2730_v39  ;;  %v1068_v39 = vmax.f32 %v1003_v57, 0.0  ;;  %v3233_v57 = vpop.permute.xlu2 %1120 }
 0x1a7   : > { %v1101_v40 = vpack.c.bf16 %v1069_v27, %v1067_v9  ;;  %v2076_v9 = vld [vmem:[%s3510_s4 + $0x58] sm:$0xf0] }
 0x1a8   : > { %1301 = vmatmul.bf16.gmra.mxu2 %v3114_v21  ;;  %v1070_v51 = vmax.f32 %v1005_v55, 0.0 }
 0x1a9   : > { %1312 = vmatpush.bf16.msra.mxu3 %v1101_v40 }
 0x1aa   : > { %v1102_v33 = vpack.c.bf16 %v1070_v51, %v1068_v39 }
 0x1ad   : > { %1313 = vmatpush.bf16.msra.mxu3 %v1099_v32 }
 0x1b1   : > { %1314 = vmatpush.bf16.msra.mxu3 %v1097_v23 }
 0x1b5   : > { %1315 = vmatpush.bf16.msra.mxu3 %v1095_v7  ;;  %v3230_v7 = vpop.permute.xlu1 %1115 }
 0x1b8   : > { %1306 = vmatmul.bf16.gmra.mxu2 %v3128_v63 }
 0x1b9   : > { %1316 = vmatpush.bf16.msra.mxu3 %v1093_v11  ;;  %v998_v11 = vadd.f32 %v997_v60, %v2742_v44  ;;  %v990_v44 = vadd.f32 %v3083_v31, %v2795_v0  ;;  %v2044_v0 = vld [vmem:[%s3510_s4 + $0x18] sm:$0xf0]  ;;  %v2052_v31 = vld [vmem:[%s3510_s4 + $0x28] sm:$0xf0] }
 0x1ba   : > { %v2047_v18 = vor.u32 %v2121_v45, %v2044_v0 }
 0x1bb   : > { %v1058_v58 = vmax.f32 %v990_v44, 0.0 }
 0x1bd   : > { %1317 = vmatpush.bf16.msra.mxu3 %v3049_v48  ;;  %v995_v48 = vadd.f32 %v994_v1, %v2726_v38  ;;  %v1060_v1 = vmax.f32 %v993_v43, 0.0  ;;  %v3245_v43 = vpop.permute.xlu1 %1130 }
 0x1bf   : > { %v1062_v60 = vmax.f32 %v995_v48, 0.0  ;;  %v3241_v48 = vpop.permute.xlu2 %1135 }
 0x1c1   : > { %1318 = vmatpush.bf16.msra.mxu3 %v3026_v22  ;;  %v1064_v22 = vmax.f32 %v998_v11, 0.0  ;;  %v1098_v30 = vpack.c.bf16 %v1062_v60, %v1060_v1  ;;  %v3238_v11 = vpop.permute.xlu0 %1125 }
 0x1c3   : > { %v1100_v38 = vpack.c.bf16 %v1066_v20, %v1064_v22 }
 0x1c5   : > { %1319 = vmatpush.bf16.msra.mxu3 %v2996_v53  ;;  %v1056_v53 = vmax.f32 %v988_v17, 0.0 }
 0x1c7   : > { %v1096_v49 = vpack.c.bf16 %v1058_v58, %v1056_v53  ;;  %v3258_v58 = vpop.permute.xlu1 %1145 }
 0x1c8   : > { %1320 = vmatmul.bf16.vlgmr.msra.gmra.mxu3 %v3144_v41  ;;  %1369 = vmatmul.bf16.vlgmr.msrb.gmra.mxu2 %v3019_v46  ;;  %v2123_v46 = vld [vmem:[%s3510_s4 + $0x24] sm:$0xf] }
 0x1c9   : > { %1410 = vmatpush.bf16.msrb.mxu3 %v1102_v33  ;;  %v2055_v52 = vor.u32 %v2123_v46, %v2052_v31  ;;  %v3248_v17 = vpop.permute.xlu0 %1140 }
 0x1cd   : > { %1411 = vmatpush.bf16.msrb.mxu3 %v1100_v38  ;;  %v3252_v38 = vpop.permute.xlu2 %1150 }
 0x1d1   : > { %1412 = vmatpush.bf16.msrb.mxu3 %v1098_v30  ;;  %v3262_v45 = vpop.permute.xlu0 %1155 }
 0x1d5   : > { %1413 = vmatpush.bf16.msrb.mxu3 %v1096_v49  ;;  %v3264_v0 = vpop.permute.xlu2 %1165 }
 0x1d8   : > { %1325 = vmatmul.bf16.gmra.mxu3 %v2047_v18  ;;  %1374 = vmatmul.bf16.gmra.mxu2 %v3046_v15  ;;  %v2125_v15 = vld [vmem:[%s3510_s4 + $0x34] sm:$0xf] }
 0x1d9   : > { %1414 = vmatpush.bf16.msrb.mxu3 %v3069_v12 }
 0x1dd   : > { %1415 = vmatpush.bf16.msrb.mxu3 %v3051_v34  ;;  %v1272_v34 = vpop.f32.mrf.mxu2 }
 0x1e1   : > { %1416 = vmatpush.bf16.msrb.mxu3 %v3042_v24  ;;  %v2060_v24 = vld [vmem:[%s3510_s4 + $0x38] sm:$0xf0] }
 0x1e2   : > { %v3179_v12 = vor.u32 %v2125_v15, %v2060_v24  ;;  %v3271_v24 = vpop.permute.xlu1 %1160 }
 0x1e5   : > { %1417 = vmatpush.bf16.msrb.mxu3 %v3044_v25  ;;  %v1274_v25 = vpop.f32.mrf.mxu2 }
 0x1e6   : > { %v1275_v23 = vadd.f32 %v1274_v25, %v3227_v47  ;;  %v3276_v25 = vpop.permute.xlu2 %1180 }
 0x1e8   : > { %1330 = vmatmul.bf16.gmra.mxu3 %v2055_v52  ;;  %1379 = vmatmul.bf16.gmra.mxu2 %v3067_v10  ;;  %v2127_v10 = vld [vmem:[%s3510_s4 + $0x44] sm:$0xf] }
 0x1e9   : > { %v3189_v3 = vor.u32 %v2127_v10, %v2068_v62 }
 0x1ed   : > { %v1277_v16 = vpop.f32.mrf.mxu2 }
 0x1f5   : > { %v1279_v4 = vpop.f32.mrf.mxu2 }
 0x1f6   : > { %v1280_v54 = vadd.f32 %v1279_v4, %v3233_v57 }
 0x1f8   : > { %1335 = vmatmul.bf16.gmra.mxu3 %v3179_v12  ;;  %1384 = vmatmul.bf16.gmra.mxu2 %v3080_v28  ;;  %v2129_v28 = vld [vmem:[%s3510_s4 + $0x54] sm:$0xf] }
 0x1f9   : > { %v3199_v27 = vor.u32 %v2129_v28, %v2076_v9 }
 0x1fd   : > { %v1282_v29 = vpop.f32.mrf.mxu2 }
 0x1fe   : > { %v1283_v39 = vadd.f32 %v1282_v29, %v3238_v11  ;;  %v3281_v29 = vpop.permute.xlu1 %1175 }
 0x205   : > { %v1284_v40 = vpop.f32.mrf.mxu2 }
 0x206   : > { %v1285_v22 = vadd.f32 %v1284_v40, %v3245_v43 }
 0x208   : > { %1340 = vmatmul.bf16.gmra.mxu3 %v3189_v3  ;;  %1389 = vmatmul.bf16.gmra.mxu2 %v3091_v2  ;;  %v2131_v2 = vld [vmem:[%s3510_s4 + $0x64] sm:$0xf] }
 0x209   : > { %v3209_v35 = vor.u32 %v2131_v2, %v2084_v6 }
 0x20d   : > { %v1287_v14 = vpop.f32.mrf.mxu2 }
 0x20e   : > { %v1288_v53 = vadd.f32 %v1287_v14, %v3241_v48 }
 0x215   : > { %v1289_v32 = vpop.f32.mrf.mxu2 }
 0x216   : > { %v1290_v46 = vadd.f32 %v1289_v32, %v3248_v17 }
 0x218   : > { %1345 = vmatmul.bf16.gmra.mxu3 %v3199_v27  ;;  %1394 = vmatmul.bf16.gmra.mxu2 %v3102_v61  ;;  %v2133_v61 = vld [vmem:[%s3510_s4 + $0x74] sm:$0xf] }
 0x219   : > { %v3219_v42 = vor.u32 %v2133_v61, %v2092_v26  ;;  %v3286_v61 = vpop.permute.xlu2 %1679 }
 0x21d   : > { %v1292_v59 = vpop.f32.mrf.mxu2 }
 0x21e   : > { %v1293_v10 = vadd.f32 %v1292_v59, %v3258_v58 }
 0x225   : > { %v1294_v51 = vpop.f32.mrf.mxu2 }
 0x228   : > { %1350 = vmatmul.bf16.gmra.mxu3 %v3209_v35  ;;  %1399 = vmatmul.bf16.gmra.mxu2 %v3114_v21  ;;  %v1273_v21 = vadd.f32 %v1272_v34, %v3224_v19  ;;  %v3273_v34 = vpop.permute.xlu0 %1170 }
 0x22d   : > { %v1297_v33 = vpop.f32.mrf.mxu2 }
 0x230   : > { %v3283_v40 = vpop.permute.xlu0 %1669 }
 0x235   : > { %v3254_v1 = vpop.f32.mrf.mxu2 }
 0x238   : > { %1355 = vmatmul.bf16.gmra.mxu3 %v3219_v42  ;;  %1404 = vmatmul.bf16.gmra.mxu2 %v3128_v63  ;;  %v1278_v63 = vadd.f32 %v1277_v16, %v3230_v7 }
 0x248   : > { %1418 = vmatmul.bf16.vlgmr.msrb.gmra.mxu3 %v3144_v41 }
 0x24b   : > { %v1321_v5 = vpop.f32.mrf.mxu3 }
 0x24c   : > { %v1322_v8 = vadd.f32 %v1321_v5, %v1273_v21 }
 0x253   : > { %v1323_v36 = vpop.f32.mrf.mxu3 }
 0x254   : > { %v1324_v13 = vadd.f32 %v1323_v36, %v1275_v23 }
 0x256   : > { %v1461_v4 = vsub.f32 0.0, %v1324_v13 }
 0x258   : > { %1423 = vmatmul.bf16.gmra.mxu3 %v2047_v18  ;;  %v3266_v18 = vpop.f32.mrf.mxu2  ;;  %v1479_v2 = vmul.f32 1.442695, %v1461_v4 }
 0x25b   : > { %v1326_v50 = vpop.f32.mrf.mxu3 }
 0x25c   : > { %v1327_v55 = vadd.f32 %v1326_v50, %v1278_v63  ;;  %v3291_v63 = vpop.permute.xlu1 %1674 }
 0x25e   : > { %v1463_v21 = vsub.f32 0.0, %v1327_v55 }
 0x260   : > { %v3279_v62 = vpop.f32.mrf.mxu2  ;;  %v1483_v13 = vmul.f32 1.442695, %v1463_v21 }
 0x263   : > { %v1328_v56 = vpop.f32.mrf.mxu3 }
 0x264   : > { %v3236_v37 = vadd.f32 %v1328_v56, %v1280_v54  ;;  %v3294_v56 = vpop.permute.xlu0 %1684 }
 0x268   : > { %1428 = vmatmul.bf16.gmra.mxu3 %v2055_v52  ;;  %v1459_v52 = vsub.f32 0.0, %v1322_v8  ;;  %v3288_v32 = vpop.f32.mrf.mxu2 }
 0x26b   : > { %v1331_v20 = vpop.f32.mrf.mxu3 }
 0x26c   : > { %v3243_v41 = vadd.f32 %v1331_v20, %v1283_v39  ;;  %v1465_v39 = vsub.f32 0.0, %v3236_v37  ;;  %v1300_v37 = vadd.f32 %v3254_v1, %v3271_v24  ;;  %v3309_v21 = vpop.permute.xlu0 %1699 }
 0x273   : > { %v1333_v44 = vpop.f32.mrf.mxu3 }
 0x274   : > { %v3250_v60 = vadd.f32 %v1333_v44, %v1285_v22  ;;  %v3297_v22 = vpop.permute.xlu2 %1694  ;;  %v3299_v44 = vpop.f32.mrf.mxu2 }
 0x278   : > { %1433 = vmatmul.bf16.gmra.mxu3 %v3179_v12  ;;  %v1475_v12 = vmul.f32 1.442695, %v1459_v52 }
 0x27a   : > { %2197 = vpow2.f32 %v1475_v12 }
 0x27b   : > { %v1336_v30 = vpop.f32.mrf.mxu3 }
 0x27c   : > { %v3260_v49 = vadd.f32 %v1336_v30, %v1288_v53 }
 0x280   : > { %v2198_v14 = vpop.eup %2197 }
 0x281   : > { %v1507_v8 = vadd.f32 1.0, %v2198_v14  ;;  %v1467_v14 = vsub.f32 0.0, %v3243_v41 }
 0x283   : > { %v1338_v31 = vpop.f32.mrf.mxu3 }
 0x284   : > { %v3269_v15 = vadd.f32 %v1338_v31, %v1290_v46  ;;  %v1487_v46 = vmul.f32 1.442695, %v1465_v39 }
 0x288   : > { %1438 = vmatmul.bf16.gmra.mxu3 %v3189_v3  ;;  %v1295_v3 = vadd.f32 %v1294_v51, %v3252_v38  ;;  %v1298_v51 = vadd.f32 %v1297_v33, %v3262_v45 }
 0x28b   : > { %v1341_v16 = vpop.f32.mrf.mxu3 }
 0x28c   : > { %v1342_v28 = vadd.f32 %v1341_v16, %v1293_v10  ;;  %v2325_v16 = vld [vmem:[%s2557_s19] sm:$0xff] }
 0x28e   : > { %v1555_v9 = vsub.f32 0.0, %v1342_v28  ;;  %v2326_v28 = vld [vmem:[%s2562_s22] sm:$0xff] }
 0x290   : > { %v1571_v6 = vmul.f32 1.442695, %v1555_v9 }
 0x292   : > { %2199 = vpow2.f32 %v1571_v6 }
 0x293   : > { %v1343_v26 = vpop.f32.mrf.mxu3  ;;  %2201 = vpow2.f32 %v1479_v2  ;;  %v3305_v2 = vpop.permute.xlu1 %1689 }
 0x294   : > { %v1344_v5 = vadd.f32 %v1343_v26, %v1295_v3  ;;  %2203 = vrcp.f32 %v1507_v8 }
 0x296   : > { %v1557_v23 = vsub.f32 0.0, %v1344_v5 }
 0x298   : > { %v2200_v36 = vpop.eup %2199  ;;  %v1575_v59 = vmul.f32 1.442695, %v1557_v23  ;;  %1443 = vmatmul.bf16.gmra.mxu3 %v3199_v27 }
 0x299   : > { %v1603_v50 = vadd.f32 1.0, %v2200_v36  ;;  %v2202_v54 = vpop.eup %2201  ;;  %v3314_v36 = vpop.permute.xlu2 %1725 }
 0x29a   : > { %2205 = vpow2.f32 %v1575_v59  ;;  %v1509_v27 = vadd.f32 1.0, %v2202_v54  ;;  %v2204_v30 = vpop.eup %2203  ;;  %v3316_v59 = vpop.f32.mrf.mxu2 }
 0x29b   : > { %2207 = vrcp.f32 %v1603_v50  ;;  %v1346_v55 = vpop.f32.mrf.mxu3  ;;  %v1539_v4 = vmul.f32 %v2325_v16, %v2204_v30  ;;  %v1491_v50 = vmul.f32 1.442695, %v1467_v14 }
 0x29c   : > { %2209 = vpow2.f32 %v1483_v13  ;;  %v1347_v20 = vadd.f32 %v1346_v55, %v1298_v51  ;;  %v1303_v55 = vadd.f32 %v3266_v18, %v3264_v0 }
 0x29d   : > { %2211 = vrcp.f32 %v1509_v27  ;;  %v2327_v27 = vld [vmem:[%s2557_s19 + $0x10] sm:$0xff] }
 0x29e   : > { %v1559_v53 = vsub.f32 0.0, %v1347_v20 }
 0x2a0   : > { %v2206_v33 = vpop.eup %2205  ;;  %v1579_v31 = vmul.f32 1.442695, %v1559_v53 }
 0x2a1   : > { %v2208_v52 = vpop.eup %2207  ;;  %v1605_v12 = vadd.f32 1.0, %v2206_v33  ;;  %v2328_v33 = vld [vmem:[%s2562_s22 + $0x10] sm:$0xff] }
 0x2a2   : > { %v2210_v10 = vpop.eup %2209  ;;  %v1635_v9 = vmul.f32 %v2326_v28, %v2208_v52  ;;  %2213 = vpow2.f32 %v1579_v31  ;;  %v1469_v52 = vsub.f32 0.0, %v3250_v60  ;;  %v3331_v28 = vpop.permute.xlu0 %1730 }
 0x2a3   : > { %2215 = vrcp.f32 %v1605_v12  ;;  %v1348_v6 = vpop.f32.mrf.mxu3  ;;  %v1511_v5 = vadd.f32 1.0, %v2210_v10  ;;  %v2212_v23 = vpop.eup %2211 }
 0x2a4   : > { %2217 = vpow2.f32 %v1487_v46  ;;  %v1651_v3 = vadd.f32 %v1635_v9, %v1539_v4  ;;  %v1349_v26 = vadd.f32 %v1348_v6, %v1300_v37  ;;  %v1541_v53 = vmul.f32 %v2327_v27, %v2212_v23  ;;  %v3328_v12 = vpop.permute.xlu1 %1704  ;;  %v2329_v23 = vld [vmem:[%s2557_s19 + $0x20] sm:$0xff] }
 0x2a5   : > { %2219 = vrcp.f32 %v1511_v5  ;;  %v1495_v6 = vmul.f32 1.442695, %v1469_v52 }
 0x2a6   : > { %v1707_v1 = vmul.f32 %v3283_v40, %v1651_v3  ;;  %v1561_v8 = vsub.f32 0.0, %v1349_v26  ;;  %v1305_v26 = vadd.f32 %v3279_v62, %v3273_v34 }
 0x2a8   : > { %v2214_v13 = vpop.eup %2213  ;;  %v1763_v41 = vadd.f32 %v3314_v36, %v1707_v1  ;;  %v1583_v54 = vmul.f32 1.442695, %v1561_v8  ;;  %1448 = vmatmul.bf16.gmra.mxu3 %v3209_v35  ;;  %v3336_v8 = vpop.f32.mrf.mxu2 }
 0x2a9   : > { %v2216_v51 = vpop.eup %2215  ;;  %v1607_v39 = vadd.f32 1.0, %v2214_v13 }
 0x2aa   : > { %v2218_v20 = vpop.eup %2217  ;;  %v1779_v30 = vmax.f32 %v1763_v41, 0.0  ;;  %v1637_v46 = vmul.f32 %v2328_v33, %v2216_v51  ;;  %2221 = vpow2.f32 %v1583_v54  ;;  %v2330_v41 = vld [vmem:[%s2562_s22 + $0x20] sm:$0xff] }
 0x2ab   : > { %2223 = vrcp.f32 %v1607_v39  ;;  %v1351_v31 = vpop.f32.mrf.mxu3  ;;  %v1513_v10 = vadd.f32 1.0, %v2218_v20  ;;  %v2220_v4 = vpop.eup %2219 }
 0x2ac   : > { %2225 = vpow2.f32 %v1491_v50  ;;  %1795 = vst [vmem:[%s3325_s20] sm:$0xff] %v1779_v30  ;;  %v1653_v35 = vadd.f32 %v1637_v46, %v1541_v53  ;;  %v1352_v18 = vadd.f32 %v1351_v31, %v1303_v55  ;;  %v1543_v13 = vmul.f32 %v2329_v23, %v2220_v4  ;;  %v3343_v33 = vpop.permute.xlu1 %1735 }
 0x2ad   : > { %2227 = vrcp.f32 %v1513_v10  ;;  %v1471_v55 = vsub.f32 0.0, %v3260_v49 }
 0x2ae   : > { %v1709_v37 = vmul.f32 %v3291_v63, %v1653_v35  ;;  %v1563_v16 = vsub.f32 0.0, %v1352_v18  ;;  %v1308_v18 = vadd.f32 %v3288_v32, %v3281_v29 }
 0x2af   : > { %v1499_v31 = vmul.f32 1.442695, %v1471_v55 }
 0x2b0   : > { %v2222_v9 = vpop.eup %2221  ;;  %v1765_v60 = vadd.f32 %v3331_v28, %v1709_v37  ;;  %v1587_v14 = vmul.f32 1.442695, %v1563_v16  ;;  %v2331_v16 = vld [vmem:[%s2557_s19 + $0x30] sm:$0xff] }
 0x2b1   : > { %v2224_v3 = vpop.eup %2223  ;;  %v1609_v5 = vadd.f32 1.0, %v2222_v9 }
 0x2b2   : > { %v2226_v1 = vpop.eup %2225  ;;  %v1781_v50 = vmax.f32 %v1765_v60, 0.0  ;;  %v1639_v54 = vmul.f32 %v2330_v41, %v2224_v3  ;;  %2229 = vpow2.f32 %v1587_v14  ;;  %v3351_v3 = vpop.f32.mrf.mxu2 }
 0x2b3   : > { %2231 = vrcp.f32 %v1609_v5  ;;  %v1353_v51 = vpop.f32.mrf.mxu3  ;;  %v1515_v62 = vadd.f32 1.0, %v2226_v1  ;;  %v2228_v30 = vpop.eup %2227 }
 0x2b4   : > { %2233 = vpow2.f32 %v1495_v6  ;;  %1797 = vst [vmem:[%s3325_s20 + $0x10] sm:$0xff] %v1781_v50  ;;  %v1655_v39 = vadd.f32 %v1639_v54, %v1543_v13  ;;  %v1354_v20 = vadd.f32 %v1353_v51, %v1305_v26  ;;  %v1545_v4 = vmul.f32 %v2331_v16, %v2228_v30  ;;  %v2332_v6 = vld [vmem:[%s2562_s22 + $0x30] sm:$0xff]  ;;  %v3356_v50 = vpop.permute.xlu2 %1740 }
 0x2b5   : > { %2235 = vrcp.f32 %v1515_v62 }
 0x2b6   : > { %v1711_v27 = vmul.f32 %v3286_v61, %v1655_v39  ;;  %v1565_v53 = vsub.f32 0.0, %v1354_v20 }
 0x2b8   : > { %v2230_v46 = vpop.eup %2229  ;;  %v1767_v52 = vadd.f32 %v3343_v33, %v1711_v27  ;;  %v1591_v35 = vmul.f32 1.442695, %v1565_v53  ;;  %1453 = vmatmul.bf16.gmra.mxu3 %v3219_v42  ;;  %v1473_v42 = vsub.f32 0.0, %v3269_v15  ;;  %v1310_v15 = vadd.f32 %v3299_v44, %v3276_v25  ;;  %v2333_v27 = vld [vmem:[%s2557_s19 + $0x40] sm:$0xff] }
 0x2b9   : > { %v2232_v49 = vpop.eup %2231  ;;  %v1611_v10 = vadd.f32 1.0, %v2230_v46  ;;  %v2334_v46 = vld [vmem:[%s2562_s22 + $0x40] sm:$0xff] }
 0x2ba   : > { %v2234_v37 = vpop.eup %2233  ;;  %v1783_v9 = vmax.f32 %v1767_v52, 0.0  ;;  %v1641_v60 = vmul.f32 %v2332_v6, %v2232_v49  ;;  %2237 = vpow2.f32 %v1591_v35  ;;  %v1503_v54 = vmul.f32 1.442695, %v1473_v42 }
 0x2bb   : > { %2239 = vrcp.f32 %v1611_v10  ;;  %v1356_v14 = vpop.f32.mrf.mxu3  ;;  %v1517_v5 = vadd.f32 1.0, %v2234_v37  ;;  %v2236_v13 = vpop.eup %2235  ;;  %v1371_v42 = vadd.f32 %v3316_v59, %v3224_v19 }
 0x2bc   : > { %2241 = vpow2.f32 %v1499_v31  ;;  %1799 = vst [vmem:[%s3325_s20 + $0x20] sm:$0xff] %v1783_v9  ;;  %v1657_v26 = vadd.f32 %v1641_v60, %v1545_v4  ;;  %v1357_v32 = vadd.f32 %v1356_v14, %v1308_v18  ;;  %v1547_v53 = vmul.f32 %v2333_v27, %v2236_v13  ;;  %v3364_v10 = vpop.f32.mrf.mxu2  ;;  %v3367_v4 = vpop.permute.xlu0 %1745  ;;  %v2336_v13 = vld [vmem:[%s2562_s22 + $0x50] sm:$0xff] }
 0x2bd   : > { %2243 = vrcp.f32 %v1517_v5  ;;  %v2335_v5 = vld [vmem:[%s2557_s19 + $0x50] sm:$0xff] }
 0x2be   : > { %v1713_v1 = vmul.f32 %v3294_v56, %v1657_v26  ;;  %v1567_v23 = vsub.f32 0.0, %v1357_v32 }
 0x2c0   : > { %v2238_v41 = vpop.eup %2237  ;;  %v1769_v51 = vadd.f32 %v3356_v50, %v1713_v1  ;;  %v1595_v55 = vmul.f32 1.442695, %v1567_v23 }
 0x2c1   : > { %v2240_v39 = vpop.eup %2239  ;;  %v1613_v20 = vadd.f32 1.0, %v2238_v41 }
 0x2c2   : > { %v2242_v62 = vpop.eup %2241  ;;  %v1785_v30 = vmax.f32 %v1769_v51, 0.0  ;;  %v1643_v31 = vmul.f32 %v2334_v46, %v2240_v39  ;;  %2245 = vpow2.f32 %v1595_v55  ;;  %v1373_v46 = vadd.f32 %v3336_v8, %v3227_v47 }
 0x2c3   : > { %2247 = vrcp.f32 %v1613_v20  ;;  %v1358_v52 = vpop.f32.mrf.mxu3  ;;  %v1519_v18 = vadd.f32 1.0, %v2242_v62  ;;  %v2244_v16 = vpop.eup %2243 }
 0x2c4   : > { %2249 = vpow2.f32 %v1503_v54  ;;  %1801 = vst [vmem:[%s3325_s20 + $0x30] sm:$0xff] %v1785_v30  ;;  %v1659_v35 = vadd.f32 %v1643_v31, %v1547_v53  ;;  %v1359_v49 = vadd.f32 %v1358_v52, %v1310_v15  ;;  %v1549_v1 = vmul.f32 %v2335_v5, %v2244_v16  ;;  %v3378_v15 = vpop.permute.xlu1 %1750  ;;  %v1380_v62 = vpop.f32.mrf.mxu2  ;;  %v2337_v31 = vld [vmem:[%s2557_s19 + $0x60] sm:$0xff] }
 0x2c5   : > { %2251 = vrcp.f32 %v1519_v18 }
 0x2c6   : > { %v1715_v44 = vmul.f32 %v3305_v2, %v1659_v35  ;;  %v1569_v37 = vsub.f32 0.0, %v1359_v49  ;;  %v2338_v49 = vld [vmem:[%s2562_s22 + $0x60] sm:$0xff] }
 0x2c8   : > { %v2246_v9 = vpop.eup %2245  ;;  %v1771_v6 = vadd.f32 %v3367_v4, %v1715_v44  ;;  %v1599_v60 = vmul.f32 1.442695, %v1569_v37 }
 0x2c9   : > { %v2248_v14 = vpop.eup %2247  ;;  %v1615_v26 = vadd.f32 1.0, %v2246_v9 }
 0x2ca   : > { %v2250_v32 = vpop.eup %2249  ;;  %v1787_v23 = vmax.f32 %v1771_v6, 0.0  ;;  %v1645_v41 = vmul.f32 %v2336_v13, %v2248_v14  ;;  %2253 = vpow2.f32 %v1599_v60  ;;  %v3387_v60 = vpop.permute.xlu2 %1755  ;;  %v1376_v14 = vadd.f32 %v3351_v3, %v3230_v7 }
 0x2cb   : > { %2255 = vrcp.f32 %v1615_v26  ;;  %v1419_v54 = vpop.f32.mrf.mxu3  ;;  %v1521_v39 = vadd.f32 1.0, %v2250_v32  ;;  %v2252_v59 = vpop.eup %2251  ;;  %v2339_v26 = vld [vmem:[%s2557_s19 + $0x70] sm:$0xff]  ;;  %v1378_v7 = vadd.f32 %v3364_v10, %v3233_v57 }
 0x2cc   : > { %1803 = vst [vmem:[%s3325_s20 + $0x40] sm:$0xff] %v1787_v23  ;;  %v1661_v51 = vadd.f32 %v1645_v41, %v1549_v1  ;;  %v3375_v55 = vadd.f32 %v1419_v54, %v1371_v42  ;;  %v1551_v52 = vmul.f32 %v2337_v31, %v2252_v59  ;;  %v1382_v42 = vpop.f32.mrf.mxu2  ;;  %v2340_v1 = vld [vmem:[%s2562_s22 + $0x70] sm:$0xff] }
 0x2cd   : > { %2257 = vrcp.f32 %v1521_v39  ;;  %v3396_v39 = vpop.permute.xlu0 %1760 }
 0x2ce   : > { %v1717_v19 = vmul.f32 %v3297_v22, %v1661_v51 }
 0x2d0   : > { %v2254_v20 = vpop.eup %2253  ;;  %v1773_v27 = vadd.f32 %v3378_v15, %v1717_v19 }
 0x2d1   : > { %v2256_v53 = vpop.eup %2255  ;;  %v1617_v30 = vadd.f32 1.0, %v2254_v20 }
 0x2d2   : > { %v1789_v35 = vmax.f32 %v1773_v27, 0.0  ;;  %v1647_v18 = vmul.f32 %v2338_v49, %v2256_v53  ;;  %v1381_v53 = vadd.f32 %v1380_v62, %v3238_v11  ;;  %v1460_v11 = vsub.f32 0.0, %v3375_v55 }
 0x2d3   : > { %2259 = vrcp.f32 %v1617_v30  ;;  %v1421_v44 = vpop.f32.mrf.mxu3  ;;  %v2258_v6 = vpop.eup %2257 }
 0x2d4   : > { %1805 = vst [vmem:[%s3325_s20 + $0x50] sm:$0xff] %v1789_v35  ;;  %v1663_v37 = vadd.f32 %v1647_v18, %v1551_v52  ;;  %v1422_v16 = vadd.f32 %v1421_v44, %v1373_v46  ;;  %v1553_v32 = vmul.f32 %v2339_v26, %v2258_v6  ;;  %v1385_v20 = vpop.f32.mrf.mxu2  ;;  %v1383_v52 = vadd.f32 %v1382_v42, %v3245_v43 }
 0x2d5   : > { %v1386_v44 = vadd.f32 %v1385_v20, %v3241_v48 }
 0x2d6   : > { %v1719_v9 = vmul.f32 %v3309_v21, %v1663_v37  ;;  %v1462_v42 = vsub.f32 0.0, %v1422_v16 }
 0x2d8   : > { %v1775_v47 = vadd.f32 %v3387_v60, %v1719_v9 }
 0x2d9   : > { %v2260_v8 = vpop.eup %2259 }
 0x2da   : > { %v1791_v5 = vmax.f32 %v1775_v47, 0.0  ;;  %v1649_v23 = vmul.f32 %v2340_v1, %v2260_v8  ;;  %v1477_v47 = vmul.f32 1.442695, %v1460_v11  ;;  %v2341_v11 = vld [vmem:[%s2557_s19 + $0x8] sm:$0xff] }
 0x2db   : > { %v1424_v13 = vpop.f32.mrf.mxu3 }
 0x2dc   : > { %1807 = vst [vmem:[%s3325_s20 + $0x60] sm:$0xff] %v1791_v5  ;;  %v1665_v41 = vadd.f32 %v1649_v23, %v1553_v32  ;;  %v1425_v54 = vadd.f32 %v1424_v13, %v1376_v14  ;;  %v1387_v31 = vpop.f32.mrf.mxu2  ;;  %2261 = vpow2.f32 %v1477_v47  ;;  %v1481_v32 = vmul.f32 1.442695, %v1462_v42 }
 0x2dd   : > { %v1388_v37 = vadd.f32 %v1387_v31, %v3248_v17 }
 0x2de   : > { %v1721_v51 = vmul.f32 %v3328_v12, %v1665_v41  ;;  %v1464_v55 = vsub.f32 0.0, %v1425_v54 }
 0x2e0   : > { %v1777_v19 = vadd.f32 %v3396_v39, %v1721_v51 }
 0x2e2   : > { %v1793_v3 = vmax.f32 %v1777_v19, 0.0  ;;  %v2262_v1 = vpop.eup %2261 }
 0x2e3   : > { %v1426_v59 = vpop.f32.mrf.mxu3  ;;  %v1508_v41 = vadd.f32 1.0, %v2262_v1 }
 0x2e4   : > { %1809 = vst [vmem:[%s3325_s20 + $0x70] sm:$0xff] %v1793_v3  ;;  %v1427_v27 = vadd.f32 %v1426_v59, %v1378_v7  ;;  %v1390_v18 = vpop.f32.mrf.mxu2  ;;  %v1485_v7 = vmul.f32 1.442695, %v1464_v55 }
 0x2e5   : > { %v1391_v43 = vadd.f32 %v1390_v18, %v3258_v58 }
 0x2eb   : > { %v1429_v30 = vpop.f32.mrf.mxu3 }
 0x2ec   : > { %v3403_v46 = vadd.f32 %v1429_v30, %v1381_v53  ;;  %v1392_v9 = vpop.f32.mrf.mxu2 }
 0x2ed   : > { %v1393_v17 = vadd.f32 %v1392_v9, %v3252_v38  ;;  %v1466_v38 = vsub.f32 0.0, %v1427_v27 }
 0x2f3   : > { %v1431_v35 = vpop.f32.mrf.mxu3 }
 0x2f4   : > { %v3406_v49 = vadd.f32 %v1431_v35, %v1383_v52  ;;  %v1395_v14 = vpop.f32.mrf.mxu2 }
 0x2f5   : > { %v1396_v20 = vadd.f32 %v1395_v14, %v3262_v45  ;;  %v1468_v14 = vsub.f32 0.0, %v3403_v46 }
 0x2fb   : > { %v1434_v57 = vpop.f32.mrf.mxu3 }
 0x2fc   : > { %v3409_v10 = vadd.f32 %v1434_v57, %v1386_v44  ;;  %v1397_v51 = vpop.f32.mrf.mxu2  ;;  %v1489_v44 = vmul.f32 1.442695, %v1466_v38 }
 0x2fd   : > { %v1398_v45 = vadd.f32 %v1397_v51, %v3271_v24 }
 0x303   : > { %v1436_v6 = vpop.f32.mrf.mxu3 }
 0x304   : > { %v3413_v62 = vadd.f32 %v1436_v6, %v1388_v37  ;;  %v1400_v18 = vpop.f32.mrf.mxu2 }
 0x30b   : > { %v1439_v8 = vpop.f32.mrf.mxu3 }
 0x30c   : > { %v1440_v26 = vadd.f32 %v1439_v8, %v1391_v43  ;;  %v2342_v43 = vld [vmem:[%s2562_s22 + $0x8] sm:$0xff] }
 0x30e   : > { %v1556_v48 = vsub.f32 0.0, %v1440_v26 }
 0x310   : > { %v1573_v5 = vmul.f32 1.442695, %v1556_v48 }
 0x312   : > { %2263 = vpow2.f32 %v1573_v5 }
 0x313   : > { %v1441_v23 = vpop.f32.mrf.mxu3  ;;  %2265 = vpow2.f32 %v1481_v32 }
 0x314   : > { %v1442_v13 = vadd.f32 %v1441_v23, %v1393_v17  ;;  %2267 = vrcp.f32 %v1508_v41  ;;  %v1493_v17 = vmul.f32 1.442695, %v1468_v14  ;;  %v1401_v41 = vadd.f32 %v1400_v18, %v3264_v0 }
 0x316   : > { %v1558_v19 = vsub.f32 0.0, %v1442_v13 }
 0x318   : > { %v2264_v58 = vpop.eup %2263  ;;  %v1577_v3 = vmul.f32 1.442695, %v1558_v19  ;;  %v1402_v19 = vpop.f32.mrf.mxu2 }
 0x319   : > { %v1604_v16 = vadd.f32 1.0, %v2264_v58  ;;  %v2266_v59 = vpop.eup %2265  ;;  %v2343_v58 = vld [vmem:[%s2557_s19 + $0x18] sm:$0xff] }
 0x31a   : > { %2269 = vpow2.f32 %v1577_v3  ;;  %v1510_v30 = vadd.f32 1.0, %v2266_v59  ;;  %v2268_v52 = vpop.eup %2267 }
 0x31b   : > { %2271 = vrcp.f32 %v1604_v16  ;;  %v1444_v53 = vpop.f32.mrf.mxu3  ;;  %v1540_v47 = vmul.f32 %v2341_v11, %v2268_v52  ;;  %v2346_v11 = vld [vmem:[%s2562_s22 + $0x28] sm:$0xff] }
 0x31c   : > { %2273 = vpow2.f32 %v1485_v7  ;;  %v1445_v54 = vadd.f32 %v1444_v53, %v1396_v20 }
 0x31d   : > { %2275 = vrcp.f32 %v1510_v30 }
 0x31e   : > { %v1560_v31 = vsub.f32 0.0, %v1445_v54 }
 0x320   : > { %v2270_v35 = vpop.eup %2269  ;;  %v1581_v57 = vmul.f32 1.442695, %v1560_v31 }
 0x321   : > { %v2272_v37 = vpop.eup %2271  ;;  %v1606_v9 = vadd.f32 1.0, %v2270_v35 }
 0x322   : > { %v2274_v6 = vpop.eup %2273  ;;  %v1636_v8 = vmul.f32 %v2342_v43, %v2272_v37  ;;  %2277 = vpow2.f32 %v1581_v57  ;;  %v1403_v57 = vadd.f32 %v1402_v19, %v3273_v34  ;;  %v1405_v43 = vpop.f32.mrf.mxu2  ;;  %v1474_v19 = vsub.f32 0.0, %v3413_v62 }
 0x323   : > { %2279 = vrcp.f32 %v1606_v9  ;;  %v1446_v27 = vpop.f32.mrf.mxu3  ;;  %v1512_v48 = vadd.f32 1.0, %v2274_v6  ;;  %v2276_v1 = vpop.eup %2275  ;;  %v2345_v9 = vld [vmem:[%s2557_s19 + $0x28] sm:$0xff] }
 0x324   : > { %2281 = vpow2.f32 %v1489_v44  ;;  %v1652_v42 = vadd.f32 %v1636_v8, %v1540_v47  ;;  %v1447_v26 = vadd.f32 %v1446_v27, %v1398_v45  ;;  %v1542_v7 = vmul.f32 %v2343_v58, %v2276_v1 }
 0x325   : > { %2283 = vrcp.f32 %v1512_v48 }
 0x326   : > { %v1708_v32 = vmul.f32 %v3283_v40, %v1652_v42  ;;  %v1562_v5 = vsub.f32 0.0, %v1447_v26  ;;  %v2344_v40 = vld [vmem:[%s2562_s22 + $0x18] sm:$0xff] }
 0x328   : > { %v2278_v24 = vpop.eup %2277  ;;  %v1764_v23 = vadd.f32 %v3314_v36, %v1708_v32  ;;  %v1585_v55 = vmul.f32 1.442695, %v1562_v5  ;;  %v1470_v36 = vsub.f32 0.0, %v3406_v49 }
 0x329   : > { %v2280_v13 = vpop.eup %2279  ;;  %v1608_v46 = vadd.f32 1.0, %v2278_v24 }
 0x32a   : > { %v2282_v51 = vpop.eup %2281  ;;  %v1780_v3 = vmax.f32 %v1764_v23, 0.0  ;;  %v1638_v16 = vmul.f32 %v2344_v40, %v2280_v13  ;;  %2285 = vpow2.f32 %v1585_v55  ;;  %v1497_v52 = vmul.f32 1.442695, %v1470_v36  ;;  %v2347_v55 = vld [vmem:[%s2557_s19 + $0x38] sm:$0xff] }
 0x32b   : > { %2287 = vrcp.f32 %v1608_v46  ;;  %v1449_v59 = vpop.f32.mrf.mxu3  ;;  %v1514_v0 = vadd.f32 1.0, %v2282_v51  ;;  %v2284_v30 = vpop.eup %2283  ;;  %v2348_v46 = vld [vmem:[%s2562_s22 + $0x38] sm:$0xff]  ;;  %v1505_v36 = vmul.f32 1.442695, %v1474_v19 }
 0x32c   : > { %2289 = vpow2.f32 %v1493_v17  ;;  %1796 = vst [vmem:[%s3325_s20 + $0x8] sm:$0xff] %v1780_v3  ;;  %v1654_v20 = vadd.f32 %v1638_v16, %v1542_v7  ;;  %v1450_v53 = vadd.f32 %v1449_v59, %v1401_v41  ;;  %v1544_v6 = vmul.f32 %v2345_v9, %v2284_v30  ;;  %v2349_v30 = vld [vmem:[%s2557_s19 + $0x48] sm:$0xff]  ;;  %v2356_v19 = vld [vmem:[%s2562_s22 + $0x78] sm:$0xff] }
 0x32d   : > { %2291 = vrcp.f32 %v1514_v0  ;;  %v1406_v17 = vadd.f32 %v1405_v43, %v3281_v29  ;;  %v1407_v29 = vpop.f32.mrf.mxu2  ;;  %v2351_v43 = vld [vmem:[%s2557_s19 + $0x58] sm:$0xff] }
 0x32e   : > { %v1710_v38 = vmul.f32 %v3291_v63, %v1654_v20  ;;  %v1564_v54 = vsub.f32 0.0, %v1450_v53  ;;  %v1408_v62 = vadd.f32 %v1407_v29, %v3276_v25 }
 0x330   : > { %v2286_v31 = vpop.eup %2285  ;;  %v1766_v35 = vadd.f32 %v3331_v28, %v1710_v38  ;;  %v1589_v18 = vmul.f32 1.442695, %v1564_v54  ;;  %v1472_v28 = vsub.f32 0.0, %v3409_v10 }
 0x331   : > { %v2288_v44 = vpop.eup %2287  ;;  %v1610_v49 = vadd.f32 1.0, %v2286_v31 }
 0x332   : > { %v2290_v37 = vpop.eup %2289  ;;  %v1782_v45 = vmax.f32 %v1766_v35, 0.0  ;;  %v1640_v47 = vmul.f32 %v2346_v11, %v2288_v44  ;;  %2293 = vpow2.f32 %v1589_v18  ;;  %v1501_v32 = vmul.f32 1.442695, %v1472_v28  ;;  %v2350_v35 = vld [vmem:[%s2562_s22 + $0x48] sm:$0xff] }
 0x333   : > { %2295 = vrcp.f32 %v1610_v49  ;;  %v1451_v63 = vpop.f32.mrf.mxu3  ;;  %v1516_v34 = vadd.f32 1.0, %v2290_v37  ;;  %v2292_v26 = vpop.eup %2291 }
 0x334   : > { %2297 = vpow2.f32 %v1497_v52  ;;  %1798 = vst [vmem:[%s3325_s20 + $0x18] sm:$0xff] %v1782_v45  ;;  %v1656_v8 = vadd.f32 %v1640_v47, %v1544_v6  ;;  %v1452_v27 = vadd.f32 %v1451_v63, %v1403_v57  ;;  %v1546_v13 = vmul.f32 %v2347_v55, %v2292_v26 }
 0x335   : > { %2299 = vrcp.f32 %v1516_v34 }
 0x336   : > { %v1712_v14 = vmul.f32 %v3286_v61, %v1656_v8  ;;  %v1566_v42 = vsub.f32 0.0, %v1452_v27  ;;  %v2352_v27 = vld [vmem:[%s2562_s22 + $0x58] sm:$0xff] }
 0x338   : > { %v2294_v48 = vpop.eup %2293  ;;  %v1768_v5 = vadd.f32 %v3343_v33, %v1712_v14  ;;  %v1593_v1 = vmul.f32 1.442695, %v1566_v42 }
 0x339   : > { %v2296_v24 = vpop.eup %2295  ;;  %v1612_v10 = vadd.f32 1.0, %v2294_v48 }
 0x33a   : > { %v2298_v23 = vpop.eup %2297  ;;  %v1784_v41 = vmax.f32 %v1768_v5, 0.0  ;;  %v1642_v51 = vmul.f32 %v2348_v46, %v2296_v24  ;;  %2301 = vpow2.f32 %v1593_v1  ;;  %v2353_v1 = vld [vmem:[%s2557_s19 + $0x68] sm:$0xff]  ;;  %v2355_v46 = vld [vmem:[%s2557_s19 + $0x78] sm:$0xff]  ;;  %s2371_s19 = sshra.s32 %s1829_s26, 4  ;;  %s2372_s19 = int_to_ptr.hbm [resolvable:$true] %s2371_s19 }
 0x33b   : > { %2303 = vrcp.f32 %v1612_v10  ;;  %v1454_v61 = vpop.f32.mrf.mxu3  ;;  %v1518_v7 = vadd.f32 1.0, %v2298_v23  ;;  %v2300_v16 = vpop.eup %2299  ;;  %v2354_v10 = vld [vmem:[%s2562_s22 + $0x68] sm:$0xff]  ;;  %s2373_s22 = scalar_lea.hbm %s2372_s19, 128  ;;  %p2378_p1 = scmp.lt.s32.totalorder %s2372_s19, %s3514_s8 }
 0x33c   : > { %2305 = vpow2.f32 %v1501_v32  ;;  %1800 = vst [vmem:[%s3325_s20 + $0x28] sm:$0xff] %v1784_v41  ;;  %v1658_v33 = vadd.f32 %v1642_v51, %v1546_v13  ;;  %v1455_v58 = vadd.f32 %v1454_v61, %v1406_v17  ;;  %v1548_v31 = vmul.f32 %v2349_v30, %v2300_v16  ;;  %p2374_p12 = scmp.ne.s32.totalorder %s2372_s19, %s2373_s22  ;;  %p2379_p2 = scmp.lt.s32.totalorder %s2377_s21, %s2373_s22 }
 0x33d   : > { %2307 = vrcp.f32 %v1518_v7 }
 0x33e   : > { %v1714_v3 = vmul.f32 %v3294_v56, %v1658_v33  ;;  %v1568_v40 = vsub.f32 0.0, %v1455_v58  ;;  %p2375_p13 = pnand %p2374_p12, %p2525_p4  ;;  %p2380_p3 = por %p2379_p2, %p2378_p1 }
 0x340   : > { %v2302_v59 = vpop.eup %2301  ;;  %v1770_v20 = vadd.f32 %v3356_v50, %v1714_v3  ;;  %v1597_v53 = vmul.f32 1.442695, %v1568_v40  ;;  %p2376_p0 = pneg %p2375_p13 }
 0x341   : > { %v2304_v0 = vpop.eup %2303  ;;  %v1614_v38 = vadd.f32 1.0, %v2302_v59 }
 0x342   : > { %v2306_v54 = vpop.eup %2305  ;;  %v1786_v52 = vmax.f32 %v1770_v20, 0.0  ;;  %v1644_v18 = vmul.f32 %v2350_v35, %v2304_v0  ;;  %2309 = vpow2.f32 %v1597_v53  ;;  %p2381_p5 = pnand %p2380_p3, %p2376_p0 }
 0x343   : > { %2311 = vrcp.f32 %v1614_v38  ;;  %v1456_v56 = vpop.f32.mrf.mxu3  ;;  %v1520_v57 = vadd.f32 1.0, %v2306_v54  ;;  %v2308_v37 = vpop.eup %2307 }
 0x344   : > { %2313 = vpow2.f32 %v1505_v36  ;;  %1802 = vst [vmem:[%s3325_s20 + $0x38] sm:$0xff] %v1786_v52  ;;  %v1660_v50 = vadd.f32 %v1644_v18, %v1548_v31  ;;  %v1457_v44 = vadd.f32 %v1456_v56, %v1408_v62  ;;  %v1550_v28 = vmul.f32 %v2351_v43, %v2308_v37 }
 0x345   : > { %2315 = vrcp.f32 %v1520_v57 }
 0x346   : > { %v1716_v25 = vmul.f32 %v3305_v2, %v1660_v50  ;;  %v1570_v49 = vsub.f32 0.0, %v1457_v44 }
 0x348   : > { %v2310_v9 = vpop.eup %2309  ;;  %v1772_v6 = vadd.f32 %v3367_v4, %v1716_v25  ;;  %v1601_v45 = vmul.f32 1.442695, %v1570_v49 }
 0x349   : > { %v2312_v11 = vpop.eup %2311  ;;  %v1616_v47 = vadd.f32 1.0, %v2310_v9 }
 0x34a   : > { %v2314_v63 = vpop.eup %2313  ;;  %v1788_v8 = vmax.f32 %v1772_v6, 0.0  ;;  %v1646_v34 = vmul.f32 %v2352_v27, %v2312_v11  ;;  %2317 = vpow2.f32 %v1601_v45 }
 0x34b   : > { %2319 = vrcp.f32 %v1616_v47  ;;  %v1522_v14 = vadd.f32 1.0, %v2314_v63  ;;  %v2316_v42 = vpop.eup %2315 }
 0x34c   : > { %1804 = vst [vmem:[%s3325_s20 + $0x48] sm:$0xff] %v1788_v8  ;;  %v1662_v2 = vadd.f32 %v1646_v34, %v1550_v28  ;;  %v1552_v24 = vmul.f32 %v2353_v1, %v2316_v42 }
 0x34d   : > { %2321 = vrcp.f32 %v1522_v14 }
 0x34e   : > { %v1718_v4 = vmul.f32 %v3297_v22, %v1662_v2 }
 0x350   : > { %v2318_v26 = vpop.eup %2317  ;;  %v1774_v48 = vadd.f32 %v3378_v15, %v1718_v4 }
 0x351   : > { %v2320_v32 = vpop.eup %2319  ;;  %v1618_v5 = vadd.f32 1.0, %v2318_v26 }
 0x352   : > { %v1790_v17 = vmax.f32 %v1774_v48, 0.0  ;;  %v1648_v23 = vmul.f32 %v2354_v10, %v2320_v32 }
 0x353   : > { %2323 = vrcp.f32 %v1618_v5  ;;  %v2322_v13 = vpop.eup %2321 }
 0x354   : > { %1806 = vst [vmem:[%s3325_s20 + $0x58] sm:$0xff] %v1790_v17  ;;  %v1664_v22 = vadd.f32 %v1648_v23, %v1552_v24  ;;  %v1554_v51 = vmul.f32 %v2355_v46, %v2322_v13 }
 0x356   : > { %v1720_v55 = vmul.f32 %v3309_v21, %v1664_v22 }
 0x358   : > { %v1776_v15 = vadd.f32 %v3387_v60, %v1720_v55 }
 0x359   : > { %v2324_v41 = vpop.eup %2323 }
 0x35a   : > { %v1792_v61 = vmax.f32 %v1776_v15, 0.0  ;;  %v1650_v33 = vmul.f32 %v2356_v19, %v2324_v41 }
 0x35c   : > { %1808 = vst [vmem:[%s3325_s20 + $0x68] sm:$0xff] %v1792_v61  ;;  %v1666_v58 = vadd.f32 %v1650_v33, %v1554_v51 }
 0x35e   : > { %v1722_v21 = vmul.f32 %v3328_v12, %v1666_v58 }
 0x360   : > { %v1778_v60 = vadd.f32 %v3396_v39, %v1722_v21 }
 0x362   : > { %v1794_v7 = vmax.f32 %v1778_v60, 0.0 }
 0x364   : > { %1810 = vst [vmem:[%s3325_s20 + $0x78] sm:$0xff] %v1794_v7 }
 0x365   : > { %2384 = shalt.err (!%p2381_p5)
}
 0x366   : > { %s2438_s14 = smov 256   ;;  %s2439_s20 = smov 16  }
 0x367   : > { %2136 = dma.vmem_to_hbm [thread:$0]  (%p2525_p4), %s1827_s11, 2048, %s1829_s26, %s1812_s30, %s2438_s14, %s2438_s14, %s2439_s20  }
 0x368 PF: > { %p2142_p6 = scmp.ge.s32.totalorder %s2435_s10, 2  ;;  %s1843_s25 = sand.u32 1, %s2415_s27  }
 0x369   : > { %s1844_s12 = scalar_lea.sflag [#allocation3], %s1843_s25 }
 0x36a   : > { %p2139_p7 = pnand %p2142_p6, %p2532_p8 }
 0x36c   : > { %p2140_p9 = pneg %p2139_p7 }
 0x36e   : > { %2410 = dma.done.wait (%p2140_p9), %s1844_s12, 2048  }
 0x36f   : > { %2412 = vsyncadd (%p2140_p9), %s1844_s12, 4294965248  ;;  %s21_s10 = sadd.s32 1, %s2435_s10   ;;  %s3517_s27 = smov %s2419_s28 }
 0x370   : > { %p18_p10 = scmp.ge.s32.totalorder %s21_s10, 4   ;;  %s3518_s28 = smov %s2423_s29 }
 0x371   : > { %s3519_s29 = smov %s2538_s18  ;;  %s3520_s30 = smov %s2431_s9 }
 0x372   : > { %s3521_s9 = smov %s3523_s13  ;;  %20 = sbr.rel (!%p18_p10) target bundleno = 4 (0x4), region = 90 }
 0x377   :  { %1850 = vsyncpa [#allocation3], 1 }
 0x378   :  { %1852 = vsyncpa [#allocation3 + $0x1], 1 }

</bundles_post_ra>
